<compile_context>
chip_gen: v7x
topology: tpu7x:2x2x1
jax: 0.10.0
libtpu: 0.0.40
codegen_flags: <defaults>
</compile_context>

<pallas_src>
import functools

import jax
import jax.numpy as jnp
from jax import lax
from jax.experimental import pallas as pl
from jax.experimental.pallas import tpu as pltpu

EPS = 1e-5


# ----------------------------------------------------------------------------
# Fused kernel: three depthwise k x k convs + BN affine + ReLU6 + sum,
# on a (1, Ct, S) block with S = H*W flattened on lanes.
# ----------------------------------------------------------------------------
def _mcbconv_kernel(x_ref, p_ref, o_ref, *, W, ksizes, pmax):
    x = x_ref[0]                                   # (Ct, S)
    Ct, S = x.shape

    # one shared zero-padded slab, big enough for the largest kernel
    padlen = pmax * (W + 1)
    if padlen > 0:
        zpad = jnp.zeros((Ct, padlen), dtype=x.dtype)
        padded = jnp.concatenate([zpad, x, zpad], axis=1)   # (Ct, S + 2*padlen)
    else:
        padded = x

    # hoisted column-validity masks, one per horizontal offset db
    j_idx = lax.broadcasted_iota(jnp.int32, (1, S), 1) % W
    masks = {db: jnp.logical_and(j_idx + db >= 0, j_idx + db < W)
             for db in range(-pmax, pmax + 1)}

    # packed parameter layout: [w_0 (k0*k0) | w_1 | w_2 | scale x3 | bias x3]
    woffs = []
    off = 0
    for k in ksizes:
        woffs.append(off)
        off += k * k
    scale_off = off
    bias_off = off + len(ksizes)

    acc = jnp.zeros_like(x)
    for bi, k in enumerate(ksizes):
        P = k // 2
        wbase = woffs[bi]
        conv = jnp.zeros_like(x)
        for a in range(k):
            da = a - P
            for b in range(k):
                db = b - P
                so = padlen + da * W + db                      # static offset
                shifted = padded[:, so:so + S]                 # (Ct, S)
                if db != 0:
                    shifted = jnp.where(masks[db], shifted, 0.0)
                col = wbase + a * k + b
                conv = conv + shifted * p_ref[:, col:col + 1]
        scale = p_ref[:, scale_off + bi:scale_off + bi + 1]    # (Ct, 1)
        bias = p_ref[:, bias_off + bi:bias_off + bi + 1]       # (Ct, 1)
        acc = acc + jnp.clip(conv * scale + bias, 0.0, 6.0)    # ReLU6

    o_ref[0] = acc


def _pick_channel_tile(C):
    # keep whole C unless very large; prefer tiles that keep (8,128) alignment
    if C <= 256:
        return C
    for ct in (256, 128, 64, 32, 16, 8):
        if C % ct == 0:
            return ct
    return C


# ----------------------------------------------------------------------------
# Wrapper: fold BN into per-channel scale/bias, pack params, launch kernel.
# ----------------------------------------------------------------------------
def mcbconv_forward(x, params, kernel_sizes=(1, 3, 5), eps=EPS):
    B, C, H, W = x.shape
    S = H * W
    for k in kernel_sizes:
        assert k % 2 == 1, "only odd kernel sizes give 'same' padding (k//2)"
    pmax = max(k // 2 for k in kernel_sizes)

    # fold BatchNorm (inference mode) into per-branch per-channel scale/bias
    scales, biases, wflat = [], [], []
    for i, k in enumerate(kernel_sizes):
        inv_std = 1.0 / jnp.sqrt(params[f"var{i}"] + eps)
        s = params[f"gamma{i}"] * inv_std
        b = params[f"beta{i}"] - params[f"mean{i}"] * s
        scales.append(s.reshape(C, 1))
        biases.append(b.reshape(C, 1))
        wflat.append(params[f"w{i}"].reshape(C, k * k))

    packed = jnp.concatenate(wflat + [jnp.concatenate(scales, axis=1),
                                      jnp.concatenate(biases, axis=1)],
                             axis=1).astype(jnp.float32)       # (C, Ptot)
    Ptot = packed.shape[1]

    xf = x.reshape(B, C, S)
    Ct = _pick_channel_tile(C)
    n_ct = C // Ct

    kern = functools.partial(_mcbconv_kernel, W=W,
                             ksizes=tuple(kernel_sizes), pmax=pmax)

    out = pl.pallas_call(
        kern,
        out_shape=jax.ShapeDtypeStruct((B, C, S), x.dtype),
        grid=(B, n_ct),
        in_specs=[
            pl.BlockSpec((1, Ct, S), lambda b, c: (b, c, 0)),
            pl.BlockSpec((Ct, Ptot), lambda b, c: (c, 0)),
        ],
        out_specs=pl.BlockSpec((1, Ct, S), lambda b, c: (b, c, 0)),
        compiler_params=pltpu.CompilerParams(
            dimension_semantics=("parallel", "parallel")),
    )(xf, packed)

    return out.reshape(B, C, H, W)


# ----------------------------------------------------------------------------
# Pure-JAX reference (independent path: lax.conv_general_dilated).
# ----------------------------------------------------------------------------
def mcbconv_reference(x, params, kernel_sizes=(1, 3, 5), eps=EPS):
    B, C, H, W = x.shape
    out = jnp.zeros_like(x)
    for i, k in enumerate(kernel_sizes):
        P = k // 2
        w = params[f"w{i}"].reshape(C, 1, k, k)
        conv = lax.conv_general_dilated(
            x, w, window_strides=(1, 1), padding=((P, P), (P, P)),
            dimension_numbers=("NCHW", "OIHW", "NCHW"),
            feature_group_count=C)
        inv_std = 1.0 / jnp.sqrt(params[f"var{i}"] + eps)
        s = (params[f"gamma{i}"] * inv_std).reshape(1, C, 1, 1)
        b = (params[f"beta{i}"] - params[f"mean{i}"]
             * params[f"gamma{i}"] * inv_std).reshape(1, C, 1, 1)
        out = out + jnp.clip(conv * s + b, 0.0, 6.0)
    return out


if __name__ == "__main__":
    B, C, H, W = 2, 8, 16, 16
    kernel_sizes = (1, 3, 5)

    key = jax.random.PRNGKey(0)
    keys = jax.random.split(key, 1 + 5 * len(kernel_sizes))
    x = jax.random.normal(keys[0], (B, C, H, W), jnp.float32)

    params = {}
    for i, k in enumerate(kernel_sizes):
        kk = keys[1 + 5 * i: 1 + 5 * (i + 1)]
        params[f"w{i}"] = jax.random.normal(kk[0], (C, k, k), jnp.float32) / float(k)
        params[f"gamma{i}"] = 1.0 + 0.1 * jax.random.normal(kk[1], (C,), jnp.float32)
        params[f"beta{i}"] = 0.1 * jax.random.normal(kk[2], (C,), jnp.float32)
        params[f"mean{i}"] = 0.1 * jax.random.normal(kk[3], (C,), jnp.float32)
        params[f"var{i}"] = 0.5 + jax.random.uniform(kk[4], (C,), jnp.float32)

    out = jax.block_until_ready(mcbconv_forward(x, params, kernel_sizes))
    ref = jax.block_until_ready(mcbconv_reference(x, params, kernel_sizes))

    assert out.shape == x.shape
    if not bool(jnp.allclose(out, ref, atol=1e-4, rtol=1e-4)):
        raise AssertionError(
            f"mismatch, max abs err = {float(jnp.max(jnp.abs(out - ref)))}")
    print("KERNEL_OK")
</pallas_src>

<mosaic_0001>
module attributes {stable_mosaic.version = 11 : i64} {
  func.func @_mcbconv_kernel(%arg0: i32, %arg1: i32, %arg2: memref<1x8x256xf32, #tpu.memory_space<vmem>>, %arg3: memref<8x41xf32, #tpu.memory_space<vmem>>, %arg4: memref<1x8x256xf32, #tpu.memory_space<vmem>>) attributes {dimension_semantics = [#tpu.dimension_semantics<parallel>, #tpu.dimension_semantics<parallel>], iteration_bounds = array<i64: 2, 1>, scalar_prefetch = 0 : i64, scratch_operands = 0 : i64, tpu.core_type = #tpu.core_type<tc>, window_params = [{transform_indices = @transform_0, window_bounds = array<i64: 1, 8, 256>}, {transform_indices = @transform_1, window_bounds = array<i64: 8, 41>}, {transform_indices = @transform_2, window_bounds = array<i64: 1, 8, 256>}]} {
    %c0 = arith.constant 0 : index
    %c0_0 = arith.constant 0 : index
    %c0_1 = arith.constant 0 : index
    %0 = vector.load %arg2[%c0, %c0_0, %c0_1] : memref<1x8x256xf32, #tpu.memory_space<vmem>>, vector<1x8x256xf32>
    %1 = vector.shape_cast %0 : vector<1x8x256xf32> to vector<8x256xf32>
    %cst = arith.constant 0.000000e+00 : f32
    %2 = vector.broadcast %cst : f32 to vector<8x34xf32>
    %3 = tpu.concatenate %2, %1, %2 in 1 : vector<8x34xf32>, vector<8x256xf32>, vector<8x34xf32> -> vector<8x324xf32>
    %4 = tpu.iota {dimensions = array<i32: 1>} : vector<1x256xi32>
    %c16_i32 = arith.constant 16 : i32
    %c0_i32 = arith.constant 0 : i32
    %5 = arith.cmpi eq, %c16_i32, %c0_i32 : i32
    %c1_i32 = arith.constant 1 : i32
    %6 = arith.select %5, %c1_i32, %c16_i32 : i32
    %7 = vector.broadcast %6 : i32 to vector<1x256xi32>
    %8 = arith.remsi %4, %7 : vector<1x256xi32>
    %c0_i32_2 = arith.constant 0 : i32
    %9 = vector.broadcast %c0_i32_2 : i32 to vector<1x256xi32>
    %10 = arith.cmpi ne, %8, %9 : vector<1x256xi32>
    %c0_i32_3 = arith.constant 0 : i32
    %11 = vector.broadcast %c0_i32_3 : i32 to vector<1x256xi32>
    %12 = arith.cmpi slt, %8, %11 : vector<1x256xi32>
    %c0_i32_4 = arith.constant 0 : i32
    %13 = arith.cmpi slt, %6, %c0_i32_4 : i32
    %14 = vector.broadcast %13 : i1 to vector<1x256xi1>
    %15 = vector.broadcast %14 : vector<1x256xi1> to vector<1x256xi1>
    %16 = arith.xori %12, %15 : vector<1x256xi1>
    %17 = arith.andi %16, %10 : vector<1x256xi1>
    %18 = vector.broadcast %6 : i32 to vector<1x256xi32>
    %19 = arith.addi %8, %18 : vector<1x256xi32>
    %20 = arith.select %17, %19, %8 : vector<1x256xi1>, vector<1x256xi32>
    %c-2_i32 = arith.constant -2 : i32
    %21 = vector.broadcast %c-2_i32 : i32 to vector<1x256xi32>
    %22 = arith.addi %20, %21 : vector<1x256xi32>
    %c0_i32_5 = arith.constant 0 : i32
    %23 = vector.broadcast %c0_i32_5 : i32 to vector<1x256xi32>
    %24 = arith.cmpi sge, %22, %23 : vector<1x256xi32>
    %c-2_i32_6 = arith.constant -2 : i32
    %25 = vector.broadcast %c-2_i32_6 : i32 to vector<1x256xi32>
    %26 = arith.addi %20, %25 : vector<1x256xi32>
    %c16_i32_7 = arith.constant 16 : i32
    %27 = vector.broadcast %c16_i32_7 : i32 to vector<1x256xi32>
    %28 = arith.cmpi slt, %26, %27 : vector<1x256xi32>
    %29 = arith.andi %24, %28 : vector<1x256xi1>
    %c-1_i32 = arith.constant -1 : i32
    %30 = vector.broadcast %c-1_i32 : i32 to vector<1x256xi32>
    %31 = arith.addi %20, %30 : vector<1x256xi32>
    %c0_i32_8 = arith.constant 0 : i32
    %32 = vector.broadcast %c0_i32_8 : i32 to vector<1x256xi32>
    %33 = arith.cmpi sge, %31, %32 : vector<1x256xi32>
    %c-1_i32_9 = arith.constant -1 : i32
    %34 = vector.broadcast %c-1_i32_9 : i32 to vector<1x256xi32>
    %35 = arith.addi %20, %34 : vector<1x256xi32>
    %c16_i32_10 = arith.constant 16 : i32
    %36 = vector.broadcast %c16_i32_10 : i32 to vector<1x256xi32>
    %37 = arith.cmpi slt, %35, %36 : vector<1x256xi32>
    %38 = arith.andi %33, %37 : vector<1x256xi1>
    %c1_i32_11 = arith.constant 1 : i32
    %39 = vector.broadcast %c1_i32_11 : i32 to vector<1x256xi32>
    %40 = arith.addi %20, %39 : vector<1x256xi32>
    %c0_i32_12 = arith.constant 0 : i32
    %41 = vector.broadcast %c0_i32_12 : i32 to vector<1x256xi32>
    %42 = arith.cmpi sge, %40, %41 : vector<1x256xi32>
    %c1_i32_13 = arith.constant 1 : i32
    %43 = vector.broadcast %c1_i32_13 : i32 to vector<1x256xi32>
    %44 = arith.addi %20, %43 : vector<1x256xi32>
    %c16_i32_14 = arith.constant 16 : i32
    %45 = vector.broadcast %c16_i32_14 : i32 to vector<1x256xi32>
    %46 = arith.cmpi slt, %44, %45 : vector<1x256xi32>
    %47 = arith.andi %42, %46 : vector<1x256xi1>
    %c2_i32 = arith.constant 2 : i32
    %48 = vector.broadcast %c2_i32 : i32 to vector<1x256xi32>
    %49 = arith.addi %20, %48 : vector<1x256xi32>
    %c0_i32_15 = arith.constant 0 : i32
    %50 = vector.broadcast %c0_i32_15 : i32 to vector<1x256xi32>
    %51 = arith.cmpi sge, %49, %50 : vector<1x256xi32>
    %c2_i32_16 = arith.constant 2 : i32
    %52 = vector.broadcast %c2_i32_16 : i32 to vector<1x256xi32>
    %53 = arith.addi %20, %52 : vector<1x256xi32>
    %c16_i32_17 = arith.constant 16 : i32
    %54 = vector.broadcast %c16_i32_17 : i32 to vector<1x256xi32>
    %55 = arith.cmpi slt, %53, %54 : vector<1x256xi32>
    %56 = arith.andi %51, %55 : vector<1x256xi1>
    %cst_18 = arith.constant 0.000000e+00 : f32
    %57 = vector.broadcast %cst_18 : f32 to vector<8x256xf32>
    %cst_19 = arith.constant 0.000000e+00 : f32
    %58 = vector.broadcast %cst_19 : f32 to vector<8x256xf32>
    %59 = vector.extract_strided_slice %3 {offsets = [0, 34], sizes = [8, 256], strides = [1, 1]} : vector<8x324xf32> to vector<8x256xf32>
    %c0_20 = arith.constant 0 : index
    %c0_21 = arith.constant 0 : index
    %60 = vector.load %arg3[%c0_20, %c0_21] : memref<8x41xf32, #tpu.memory_space<vmem>>, vector<8x1xf32>
    %61 = vector.broadcast %60 : vector<8x1xf32> to vector<8x256xf32>
    %62 = arith.mulf %59, %61 : vector<8x256xf32>
    %63 = arith.addf %58, %62 : vector<8x256xf32>
    %c0_22 = arith.constant 0 : index
    %c35 = arith.constant 35 : index
    %64 = vector.load %arg3[%c0_22, %c35] : memref<8x41xf32, #tpu.memory_space<vmem>>, vector<8x1xf32>
    %c0_23 = arith.constant 0 : index
    %c38 = arith.constant 38 : index
    %65 = vector.load %arg3[%c0_23, %c38] : memref<8x41xf32, #tpu.memory_space<vmem>>, vector<8x1xf32>
    %66 = vector.broadcast %64 : vector<8x1xf32> to vector<8x256xf32>
    %67 = arith.mulf %63, %66 : vector<8x256xf32>
    %68 = vector.broadcast %65 : vector<8x1xf32> to vector<8x256xf32>
    %69 = arith.addf %67, %68 : vector<8x256xf32>
    %cst_24 = arith.constant 0.000000e+00 : f32
    %cst_25 = arith.constant 6.000000e+00 : f32
    %70 = vector.broadcast %cst_24 : f32 to vector<8x256xf32>
    %71 = arith.maximumf %70, %69 : vector<8x256xf32>
    %72 = vector.broadcast %cst_25 : f32 to vector<8x256xf32>
    %73 = arith.minimumf %72, %71 : vector<8x256xf32>
    %74 = arith.addf %57, %73 : vector<8x256xf32>
    %cst_26 = arith.constant 0.000000e+00 : f32
    %75 = vector.broadcast %cst_26 : f32 to vector<8x256xf32>
    %76 = vector.extract_strided_slice %3 {offsets = [0, 17], sizes = [8, 256], strides = [1, 1]} : vector<8x324xf32> to vector<8x256xf32>
    %cst_27 = arith.constant 0.000000e+00 : f32
    %77 = vector.shape_cast %38 : vector<1x256xi1> to vector<1x256xi1>
    %78 = vector.broadcast %77 : vector<1x256xi1> to vector<8x256xi1>
    %79 = vector.broadcast %cst_27 : f32 to vector<8x256xf32>
    %80 = arith.select %78, %76, %79 : vector<8x256xi1>, vector<8x256xf32>
    %c0_28 = arith.constant 0 : index
    %c1 = arith.constant 1 : index
    %81 = vector.load %arg3[%c0_28, %c1] : memref<8x41xf32, #tpu.memory_space<vmem>>, vector<8x1xf32>
    %82 = vector.broadcast %81 : vector<8x1xf32> to vector<8x256xf32>
    %83 = arith.mulf %80, %82 : vector<8x256xf32>
    %84 = arith.addf %75, %83 : vector<8x256xf32>
    %85 = vector.extract_strided_slice %3 {offsets = [0, 18], sizes = [8, 256], strides = [1, 1]} : vector<8x324xf32> to vector<8x256xf32>
    %c0_29 = arith.constant 0 : index
    %c2 = arith.constant 2 : index
    %86 = vector.load %arg3[%c0_29, %c2] : memref<8x41xf32, #tpu.memory_space<vmem>>, vector<8x1xf32>
    %87 = vector.broadcast %86 : vector<8x1xf32> to vector<8x256xf32>
    %88 = arith.mulf %85, %87 : vector<8x256xf32>
    %89 = arith.addf %84, %88 : vector<8x256xf32>
    %90 = vector.extract_strided_slice %3 {offsets = [0, 19], sizes = [8, 256], strides = [1, 1]} : vector<8x324xf32> to vector<8x256xf32>
    %cst_30 = arith.constant 0.000000e+00 : f32
    %91 = vector.shape_cast %47 : vector<1x256xi1> to vector<1x256xi1>
    %92 = vector.broadcast %91 : vector<1x256xi1> to vector<8x256xi1>
    %93 = vector.broadcast %cst_30 : f32 to vector<8x256xf32>
    %94 = arith.select %92, %90, %93 : vector<8x256xi1>, vector<8x256xf32>
    %c0_31 = arith.constant 0 : index
    %c3 = arith.constant 3 : index
    %95 = vector.load %arg3[%c0_31, %c3] : memref<8x41xf32, #tpu.memory_space<vmem>>, vector<8x1xf32>
    %96 = vector.broadcast %95 : vector<8x1xf32> to vector<8x256xf32>
    %97 = arith.mulf %94, %96 : vector<8x256xf32>
    %98 = arith.addf %89, %97 : vector<8x256xf32>
    %99 = vector.extract_strided_slice %3 {offsets = [0, 33], sizes = [8, 256], strides = [1, 1]} : vector<8x324xf32> to vector<8x256xf32>
    %cst_32 = arith.constant 0.000000e+00 : f32
    %100 = vector.shape_cast %38 : vector<1x256xi1> to vector<1x256xi1>
    %101 = vector.broadcast %100 : vector<1x256xi1> to vector<8x256xi1>
    %102 = vector.broadcast %cst_32 : f32 to vector<8x256xf32>
    %103 = arith.select %101, %99, %102 : vector<8x256xi1>, vector<8x256xf32>
    %c0_33 = arith.constant 0 : index
    %c4 = arith.constant 4 : index
    %104 = vector.load %arg3[%c0_33, %c4] : memref<8x41xf32, #tpu.memory_space<vmem>>, vector<8x1xf32>
    %105 = vector.broadcast %104 : vector<8x1xf32> to vector<8x256xf32>
    %106 = arith.mulf %103, %105 : vector<8x256xf32>
    %107 = arith.addf %98, %106 : vector<8x256xf32>
    %108 = vector.extract_strided_slice %3 {offsets = [0, 34], sizes = [8, 256], strides = [1, 1]} : vector<8x324xf32> to vector<8x256xf32>
    %c0_34 = arith.constant 0 : index
    %c5 = arith.constant 5 : index
    %109 = vector.load %arg3[%c0_34, %c5] : memref<8x41xf32, #tpu.memory_space<vmem>>, vector<8x1xf32>
    %110 = vector.broadcast %109 : vector<8x1xf32> to vector<8x256xf32>
    %111 = arith.mulf %108, %110 : vector<8x256xf32>
    %112 = arith.addf %107, %111 : vector<8x256xf32>
    %113 = vector.extract_strided_slice %3 {offsets = [0, 35], sizes = [8, 256], strides = [1, 1]} : vector<8x324xf32> to vector<8x256xf32>
    %cst_35 = arith.constant 0.000000e+00 : f32
    %114 = vector.shape_cast %47 : vector<1x256xi1> to vector<1x256xi1>
    %115 = vector.broadcast %114 : vector<1x256xi1> to vector<8x256xi1>
    %116 = vector.broadcast %cst_35 : f32 to vector<8x256xf32>
    %117 = arith.select %115, %113, %116 : vector<8x256xi1>, vector<8x256xf32>
    %c0_36 = arith.constant 0 : index
    %c6 = arith.constant 6 : index
    %118 = vector.load %arg3[%c0_36, %c6] : memref<8x41xf32, #tpu.memory_space<vmem>>, vector<8x1xf32>
    %119 = vector.broadcast %118 : vector<8x1xf32> to vector<8x256xf32>
    %120 = arith.mulf %117, %119 : vector<8x256xf32>
    %121 = arith.addf %112, %120 : vector<8x256xf32>
    %122 = vector.extract_strided_slice %3 {offsets = [0, 49], sizes = [8, 256], strides = [1, 1]} : vector<8x324xf32> to vector<8x256xf32>
    %cst_37 = arith.constant 0.000000e+00 : f32
    %123 = vector.shape_cast %38 : vector<1x256xi1> to vector<1x256xi1>
    %124 = vector.broadcast %123 : vector<1x256xi1> to vector<8x256xi1>
    %125 = vector.broadcast %cst_37 : f32 to vector<8x256xf32>
    %126 = arith.select %124, %122, %125 : vector<8x256xi1>, vector<8x256xf32>
    %c0_38 = arith.constant 0 : index
    %c7 = arith.constant 7 : index
    %127 = vector.load %arg3[%c0_38, %c7] : memref<8x41xf32, #tpu.memory_space<vmem>>, vector<8x1xf32>
    %128 = vector.broadcast %127 : vector<8x1xf32> to vector<8x256xf32>
    %129 = arith.mulf %126, %128 : vector<8x256xf32>
    %130 = arith.addf %121, %129 : vector<8x256xf32>
    %131 = vector.extract_strided_slice %3 {offsets = [0, 50], sizes = [8, 256], strides = [1, 1]} : vector<8x324xf32> to vector<8x256xf32>
    %c0_39 = arith.constant 0 : index
    %c8 = arith.constant 8 : index
    %132 = vector.load %arg3[%c0_39, %c8] : memref<8x41xf32, #tpu.memory_space<vmem>>, vector<8x1xf32>
    %133 = vector.broadcast %132 : vector<8x1xf32> to vector<8x256xf32>
    %134 = arith.mulf %131, %133 : vector<8x256xf32>
    %135 = arith.addf %130, %134 : vector<8x256xf32>
    %136 = vector.extract_strided_slice %3 {offsets = [0, 51], sizes = [8, 256], strides = [1, 1]} : vector<8x324xf32> to vector<8x256xf32>
    %cst_40 = arith.constant 0.000000e+00 : f32
    %137 = vector.shape_cast %47 : vector<1x256xi1> to vector<1x256xi1>
    %138 = vector.broadcast %137 : vector<1x256xi1> to vector<8x256xi1>
    %139 = vector.broadcast %cst_40 : f32 to vector<8x256xf32>
    %140 = arith.select %138, %136, %139 : vector<8x256xi1>, vector<8x256xf32>
    %c0_41 = arith.constant 0 : index
    %c9 = arith.constant 9 : index
    %141 = vector.load %arg3[%c0_41, %c9] : memref<8x41xf32, #tpu.memory_space<vmem>>, vector<8x1xf32>
    %142 = vector.broadcast %141 : vector<8x1xf32> to vector<8x256xf32>
    %143 = arith.mulf %140, %142 : vector<8x256xf32>
    %144 = arith.addf %135, %143 : vector<8x256xf32>
    %c0_42 = arith.constant 0 : index
    %c36 = arith.constant 36 : index
    %145 = vector.load %arg3[%c0_42, %c36] : memref<8x41xf32, #tpu.memory_space<vmem>>, vector<8x1xf32>
    %c0_43 = arith.constant 0 : index
    %c39 = arith.constant 39 : index
    %146 = vector.load %arg3[%c0_43, %c39] : memref<8x41xf32, #tpu.memory_space<vmem>>, vector<8x1xf32>
    %147 = vector.broadcast %145 : vector<8x1xf32> to vector<8x256xf32>
    %148 = arith.mulf %144, %147 : vector<8x256xf32>
    %149 = vector.broadcast %146 : vector<8x1xf32> to vector<8x256xf32>
    %150 = arith.addf %148, %149 : vector<8x256xf32>
    %cst_44 = arith.constant 0.000000e+00 : f32
    %cst_45 = arith.constant 6.000000e+00 : f32
    %151 = vector.broadcast %cst_44 : f32 to vector<8x256xf32>
    %152 = arith.maximumf %151, %150 : vector<8x256xf32>
    %153 = vector.broadcast %cst_45 : f32 to vector<8x256xf32>
    %154 = arith.minimumf %153, %152 : vector<8x256xf32>
    %155 = arith.addf %74, %154 : vector<8x256xf32>
    %cst_46 = arith.constant 0.000000e+00 : f32
    %156 = vector.broadcast %cst_46 : f32 to vector<8x256xf32>
    %157 = vector.extract_strided_slice %3 {offsets = [0, 0], sizes = [8, 256], strides = [1, 1]} : vector<8x324xf32> to vector<8x256xf32>
    %cst_47 = arith.constant 0.000000e+00 : f32
    %158 = vector.shape_cast %29 : vector<1x256xi1> to vector<1x256xi1>
    %159 = vector.broadcast %158 : vector<1x256xi1> to vector<8x256xi1>
    %160 = vector.broadcast %cst_47 : f32 to vector<8x256xf32>
    %161 = arith.select %159, %157, %160 : vector<8x256xi1>, vector<8x256xf32>
    %c0_48 = arith.constant 0 : index
    %c10 = arith.constant 10 : index
    %162 = vector.load %arg3[%c0_48, %c10] : memref<8x41xf32, #tpu.memory_space<vmem>>, vector<8x1xf32>
    %163 = vector.broadcast %162 : vector<8x1xf32> to vector<8x256xf32>
    %164 = arith.mulf %161, %163 : vector<8x256xf32>
    %165 = arith.addf %156, %164 : vector<8x256xf32>
    %166 = vector.extract_strided_slice %3 {offsets = [0, 1], sizes = [8, 256], strides = [1, 1]} : vector<8x324xf32> to vector<8x256xf32>
    %cst_49 = arith.constant 0.000000e+00 : f32
    %167 = vector.shape_cast %38 : vector<1x256xi1> to vector<1x256xi1>
    %168 = vector.broadcast %167 : vector<1x256xi1> to vector<8x256xi1>
    %169 = vector.broadcast %cst_49 : f32 to vector<8x256xf32>
    %170 = arith.select %168, %166, %169 : vector<8x256xi1>, vector<8x256xf32>
    %c0_50 = arith.constant 0 : index
    %c11 = arith.constant 11 : index
    %171 = vector.load %arg3[%c0_50, %c11] : memref<8x41xf32, #tpu.memory_space<vmem>>, vector<8x1xf32>
    %172 = vector.broadcast %171 : vector<8x1xf32> to vector<8x256xf32>
    %173 = arith.mulf %170, %172 : vector<8x256xf32>
    %174 = arith.addf %165, %173 : vector<8x256xf32>
    %175 = vector.extract_strided_slice %3 {offsets = [0, 2], sizes = [8, 256], strides = [1, 1]} : vector<8x324xf32> to vector<8x256xf32>
    %c0_51 = arith.constant 0 : index
    %c12 = arith.constant 12 : index
    %176 = vector.load %arg3[%c0_51, %c12] : memref<8x41xf32, #tpu.memory_space<vmem>>, vector<8x1xf32>
    %177 = vector.broadcast %176 : vector<8x1xf32> to vector<8x256xf32>
    %178 = arith.mulf %175, %177 : vector<8x256xf32>
    %179 = arith.addf %174, %178 : vector<8x256xf32>
    %180 = vector.extract_strided_slice %3 {offsets = [0, 3], sizes = [8, 256], strides = [1, 1]} : vector<8x324xf32> to vector<8x256xf32>
    %cst_52 = arith.constant 0.000000e+00 : f32
    %181 = vector.shape_cast %47 : vector<1x256xi1> to vector<1x256xi1>
    %182 = vector.broadcast %181 : vector<1x256xi1> to vector<8x256xi1>
    %183 = vector.broadcast %cst_52 : f32 to vector<8x256xf32>
    %184 = arith.select %182, %180, %183 : vector<8x256xi1>, vector<8x256xf32>
    %c0_53 = arith.constant 0 : index
    %c13 = arith.constant 13 : index
    %185 = vector.load %arg3[%c0_53, %c13] : memref<8x41xf32, #tpu.memory_space<vmem>>, vector<8x1xf32>
    %186 = vector.broadcast %185 : vector<8x1xf32> to vector<8x256xf32>
    %187 = arith.mulf %184, %186 : vector<8x256xf32>
    %188 = arith.addf %179, %187 : vector<8x256xf32>
    %189 = vector.extract_strided_slice %3 {offsets = [0, 4], sizes = [8, 256], strides = [1, 1]} : vector<8x324xf32> to vector<8x256xf32>
    %cst_54 = arith.constant 0.000000e+00 : f32
    %190 = vector.shape_cast %56 : vector<1x256xi1> to vector<1x256xi1>
    %191 = vector.broadcast %190 : vector<1x256xi1> to vector<8x256xi1>
    %192 = vector.broadcast %cst_54 : f32 to vector<8x256xf32>
    %193 = arith.select %191, %189, %192 : vector<8x256xi1>, vector<8x256xf32>
    %c0_55 = arith.constant 0 : index
    %c14 = arith.constant 14 : index
    %194 = vector.load %arg3[%c0_55, %c14] : memref<8x41xf32, #tpu.memory_space<vmem>>, vector<8x1xf32>
    %195 = vector.broadcast %194 : vector<8x1xf32> to vector<8x256xf32>
    %196 = arith.mulf %193, %195 : vector<8x256xf32>
    %197 = arith.addf %188, %196 : vector<8x256xf32>
    %198 = vector.extract_strided_slice %3 {offsets = [0, 16], sizes = [8, 256], strides = [1, 1]} : vector<8x324xf32> to vector<8x256xf32>
    %cst_56 = arith.constant 0.000000e+00 : f32
    %199 = vector.shape_cast %29 : vector<1x256xi1> to vector<1x256xi1>
    %200 = vector.broadcast %199 : vector<1x256xi1> to vector<8x256xi1>
    %201 = vector.broadcast %cst_56 : f32 to vector<8x256xf32>
    %202 = arith.select %200, %198, %201 : vector<8x256xi1>, vector<8x256xf32>
    %c0_57 = arith.constant 0 : index
    %c15 = arith.constant 15 : index
    %203 = vector.load %arg3[%c0_57, %c15] : memref<8x41xf32, #tpu.memory_space<vmem>>, vector<8x1xf32>
    %204 = vector.broadcast %203 : vector<8x1xf32> to vector<8x256xf32>
    %205 = arith.mulf %202, %204 : vector<8x256xf32>
    %206 = arith.addf %197, %205 : vector<8x256xf32>
    %207 = vector.extract_strided_slice %3 {offsets = [0, 17], sizes = [8, 256], strides = [1, 1]} : vector<8x324xf32> to vector<8x256xf32>
    %cst_58 = arith.constant 0.000000e+00 : f32
    %208 = vector.shape_cast %38 : vector<1x256xi1> to vector<1x256xi1>
    %209 = vector.broadcast %208 : vector<1x256xi1> to vector<8x256xi1>
    %210 = vector.broadcast %cst_58 : f32 to vector<8x256xf32>
    %211 = arith.select %209, %207, %210 : vector<8x256xi1>, vector<8x256xf32>
    %c0_59 = arith.constant 0 : index
    %c16 = arith.constant 16 : index
    %212 = vector.load %arg3[%c0_59, %c16] : memref<8x41xf32, #tpu.memory_space<vmem>>, vector<8x1xf32>
    %213 = vector.broadcast %212 : vector<8x1xf32> to vector<8x256xf32>
    %214 = arith.mulf %211, %213 : vector<8x256xf32>
    %215 = arith.addf %206, %214 : vector<8x256xf32>
    %216 = vector.extract_strided_slice %3 {offsets = [0, 18], sizes = [8, 256], strides = [1, 1]} : vector<8x324xf32> to vector<8x256xf32>
    %c0_60 = arith.constant 0 : index
    %c17 = arith.constant 17 : index
    %217 = vector.load %arg3[%c0_60, %c17] : memref<8x41xf32, #tpu.memory_space<vmem>>, vector<8x1xf32>
    %218 = vector.broadcast %217 : vector<8x1xf32> to vector<8x256xf32>
    %219 = arith.mulf %216, %218 : vector<8x256xf32>
    %220 = arith.addf %215, %219 : vector<8x256xf32>
    %221 = vector.extract_strided_slice %3 {offsets = [0, 19], sizes = [8, 256], strides = [1, 1]} : vector<8x324xf32> to vector<8x256xf32>
    %cst_61 = arith.constant 0.000000e+00 : f32
    %222 = vector.shape_cast %47 : vector<1x256xi1> to vector<1x256xi1>
    %223 = vector.broadcast %222 : vector<1x256xi1> to vector<8x256xi1>
    %224 = vector.broadcast %cst_61 : f32 to vector<8x256xf32>
    %225 = arith.select %223, %221, %224 : vector<8x256xi1>, vector<8x256xf32>
    %c0_62 = arith.constant 0 : index
    %c18 = arith.constant 18 : index
    %226 = vector.load %arg3[%c0_62, %c18] : memref<8x41xf32, #tpu.memory_space<vmem>>, vector<8x1xf32>
    %227 = vector.broadcast %226 : vector<8x1xf32> to vector<8x256xf32>
    %228 = arith.mulf %225, %227 : vector<8x256xf32>
    %229 = arith.addf %220, %228 : vector<8x256xf32>
    %230 = vector.extract_strided_slice %3 {offsets = [0, 20], sizes = [8, 256], strides = [1, 1]} : vector<8x324xf32> to vector<8x256xf32>
    %cst_63 = arith.constant 0.000000e+00 : f32
    %231 = vector.shape_cast %56 : vector<1x256xi1> to vector<1x256xi1>
    %232 = vector.broadcast %231 : vector<1x256xi1> to vector<8x256xi1>
    %233 = vector.broadcast %cst_63 : f32 to vector<8x256xf32>
    %234 = arith.select %232, %230, %233 : vector<8x256xi1>, vector<8x256xf32>
    %c0_64 = arith.constant 0 : index
    %c19 = arith.constant 19 : index
    %235 = vector.load %arg3[%c0_64, %c19] : memref<8x41xf32, #tpu.memory_space<vmem>>, vector<8x1xf32>
    %236 = vector.broadcast %235 : vector<8x1xf32> to vector<8x256xf32>
    %237 = arith.mulf %234, %236 : vector<8x256xf32>
    %238 = arith.addf %229, %237 : vector<8x256xf32>
    %239 = vector.extract_strided_slice %3 {offsets = [0, 32], sizes = [8, 256], strides = [1, 1]} : vector<8x324xf32> to vector<8x256xf32>
    %cst_65 = arith.constant 0.000000e+00 : f32
    %240 = vector.shape_cast %29 : vector<1x256xi1> to vector<1x256xi1>
    %241 = vector.broadcast %240 : vector<1x256xi1> to vector<8x256xi1>
    %242 = vector.broadcast %cst_65 : f32 to vector<8x256xf32>
    %243 = arith.select %241, %239, %242 : vector<8x256xi1>, vector<8x256xf32>
    %c0_66 = arith.constant 0 : index
    %c20 = arith.constant 20 : index
    %244 = vector.load %arg3[%c0_66, %c20] : memref<8x41xf32, #tpu.memory_space<vmem>>, vector<8x1xf32>
    %245 = vector.broadcast %244 : vector<8x1xf32> to vector<8x256xf32>
    %246 = arith.mulf %243, %245 : vector<8x256xf32>
    %247 = arith.addf %238, %246 : vector<8x256xf32>
    %248 = vector.extract_strided_slice %3 {offsets = [0, 33], sizes = [8, 256], strides = [1, 1]} : vector<8x324xf32> to vector<8x256xf32>
    %cst_67 = arith.constant 0.000000e+00 : f32
    %249 = vector.shape_cast %38 : vector<1x256xi1> to vector<1x256xi1>
    %250 = vector.broadcast %249 : vector<1x256xi1> to vector<8x256xi1>
    %251 = vector.broadcast %cst_67 : f32 to vector<8x256xf32>
    %252 = arith.select %250, %248, %251 : vector<8x256xi1>, vector<8x256xf32>
    %c0_68 = arith.constant 0 : index
    %c21 = arith.constant 21 : index
    %253 = vector.load %arg3[%c0_68, %c21] : memref<8x41xf32, #tpu.memory_space<vmem>>, vector<8x1xf32>
    %254 = vector.broadcast %253 : vector<8x1xf32> to vector<8x256xf32>
    %255 = arith.mulf %252, %254 : vector<8x256xf32>
    %256 = arith.addf %247, %255 : vector<8x256xf32>
    %257 = vector.extract_strided_slice %3 {offsets = [0, 34], sizes = [8, 256], strides = [1, 1]} : vector<8x324xf32> to vector<8x256xf32>
    %c0_69 = arith.constant 0 : index
    %c22 = arith.constant 22 : index
    %258 = vector.load %arg3[%c0_69, %c22] : memref<8x41xf32, #tpu.memory_space<vmem>>, vector<8x1xf32>
    %259 = vector.broadcast %258 : vector<8x1xf32> to vector<8x256xf32>
    %260 = arith.mulf %257, %259 : vector<8x256xf32>
    %261 = arith.addf %256, %260 : vector<8x256xf32>
    %262 = vector.extract_strided_slice %3 {offsets = [0, 35], sizes = [8, 256], strides = [1, 1]} : vector<8x324xf32> to vector<8x256xf32>
    %cst_70 = arith.constant 0.000000e+00 : f32
    %263 = vector.shape_cast %47 : vector<1x256xi1> to vector<1x256xi1>
    %264 = vector.broadcast %263 : vector<1x256xi1> to vector<8x256xi1>
    %265 = vector.broadcast %cst_70 : f32 to vector<8x256xf32>
    %266 = arith.select %264, %262, %265 : vector<8x256xi1>, vector<8x256xf32>
    %c0_71 = arith.constant 0 : index
    %c23 = arith.constant 23 : index
    %267 = vector.load %arg3[%c0_71, %c23] : memref<8x41xf32, #tpu.memory_space<vmem>>, vector<8x1xf32>
    %268 = vector.broadcast %267 : vector<8x1xf32> to vector<8x256xf32>
    %269 = arith.mulf %266, %268 : vector<8x256xf32>
    %270 = arith.addf %261, %269 : vector<8x256xf32>
    %271 = vector.extract_strided_slice %3 {offsets = [0, 36], sizes = [8, 256], strides = [1, 1]} : vector<8x324xf32> to vector<8x256xf32>
    %cst_72 = arith.constant 0.000000e+00 : f32
    %272 = vector.shape_cast %56 : vector<1x256xi1> to vector<1x256xi1>
    %273 = vector.broadcast %272 : vector<1x256xi1> to vector<8x256xi1>
    %274 = vector.broadcast %cst_72 : f32 to vector<8x256xf32>
    %275 = arith.select %273, %271, %274 : vector<8x256xi1>, vector<8x256xf32>
    %c0_73 = arith.constant 0 : index
    %c24 = arith.constant 24 : index
    %276 = vector.load %arg3[%c0_73, %c24] : memref<8x41xf32, #tpu.memory_space<vmem>>, vector<8x1xf32>
    %277 = vector.broadcast %276 : vector<8x1xf32> to vector<8x256xf32>
    %278 = arith.mulf %275, %277 : vector<8x256xf32>
    %279 = arith.addf %270, %278 : vector<8x256xf32>
    %280 = vector.extract_strided_slice %3 {offsets = [0, 48], sizes = [8, 256], strides = [1, 1]} : vector<8x324xf32> to vector<8x256xf32>
    %cst_74 = arith.constant 0.000000e+00 : f32
    %281 = vector.shape_cast %29 : vector<1x256xi1> to vector<1x256xi1>
    %282 = vector.broadcast %281 : vector<1x256xi1> to vector<8x256xi1>
    %283 = vector.broadcast %cst_74 : f32 to vector<8x256xf32>
    %284 = arith.select %282, %280, %283 : vector<8x256xi1>, vector<8x256xf32>
    %c0_75 = arith.constant 0 : index
    %c25 = arith.constant 25 : index
    %285 = vector.load %arg3[%c0_75, %c25] : memref<8x41xf32, #tpu.memory_space<vmem>>, vector<8x1xf32>
    %286 = vector.broadcast %285 : vector<8x1xf32> to vector<8x256xf32>
    %287 = arith.mulf %284, %286 : vector<8x256xf32>
    %288 = arith.addf %279, %287 : vector<8x256xf32>
    %289 = vector.extract_strided_slice %3 {offsets = [0, 49], sizes = [8, 256], strides = [1, 1]} : vector<8x324xf32> to vector<8x256xf32>
    %cst_76 = arith.constant 0.000000e+00 : f32
    %290 = vector.shape_cast %38 : vector<1x256xi1> to vector<1x256xi1>
    %291 = vector.broadcast %290 : vector<1x256xi1> to vector<8x256xi1>
    %292 = vector.broadcast %cst_76 : f32 to vector<8x256xf32>
    %293 = arith.select %291, %289, %292 : vector<8x256xi1>, vector<8x256xf32>
    %c0_77 = arith.constant 0 : index
    %c26 = arith.constant 26 : index
    %294 = vector.load %arg3[%c0_77, %c26] : memref<8x41xf32, #tpu.memory_space<vmem>>, vector<8x1xf32>
    %295 = vector.broadcast %294 : vector<8x1xf32> to vector<8x256xf32>
    %296 = arith.mulf %293, %295 : vector<8x256xf32>
    %297 = arith.addf %288, %296 : vector<8x256xf32>
    %298 = vector.extract_strided_slice %3 {offsets = [0, 50], sizes = [8, 256], strides = [1, 1]} : vector<8x324xf32> to vector<8x256xf32>
    %c0_78 = arith.constant 0 : index
    %c27 = arith.constant 27 : index
    %299 = vector.load %arg3[%c0_78, %c27] : memref<8x41xf32, #tpu.memory_space<vmem>>, vector<8x1xf32>
    %300 = vector.broadcast %299 : vector<8x1xf32> to vector<8x256xf32>
    %301 = arith.mulf %298, %300 : vector<8x256xf32>
    %302 = arith.addf %297, %301 : vector<8x256xf32>
    %303 = vector.extract_strided_slice %3 {offsets = [0, 51], sizes = [8, 256], strides = [1, 1]} : vector<8x324xf32> to vector<8x256xf32>
    %cst_79 = arith.constant 0.000000e+00 : f32
    %304 = vector.shape_cast %47 : vector<1x256xi1> to vector<1x256xi1>
    %305 = vector.broadcast %304 : vector<1x256xi1> to vector<8x256xi1>
    %306 = vector.broadcast %cst_79 : f32 to vector<8x256xf32>
    %307 = arith.select %305, %303, %306 : vector<8x256xi1>, vector<8x256xf32>
    %c0_80 = arith.constant 0 : index
    %c28 = arith.constant 28 : index
    %308 = vector.load %arg3[%c0_80, %c28] : memref<8x41xf32, #tpu.memory_space<vmem>>, vector<8x1xf32>
    %309 = vector.broadcast %308 : vector<8x1xf32> to vector<8x256xf32>
    %310 = arith.mulf %307, %309 : vector<8x256xf32>
    %311 = arith.addf %302, %310 : vector<8x256xf32>
    %312 = vector.extract_strided_slice %3 {offsets = [0, 52], sizes = [8, 256], strides = [1, 1]} : vector<8x324xf32> to vector<8x256xf32>
    %cst_81 = arith.constant 0.000000e+00 : f32
    %313 = vector.shape_cast %56 : vector<1x256xi1> to vector<1x256xi1>
    %314 = vector.broadcast %313 : vector<1x256xi1> to vector<8x256xi1>
    %315 = vector.broadcast %cst_81 : f32 to vector<8x256xf32>
    %316 = arith.select %314, %312, %315 : vector<8x256xi1>, vector<8x256xf32>
    %c0_82 = arith.constant 0 : index
    %c29 = arith.constant 29 : index
    %317 = vector.load %arg3[%c0_82, %c29] : memref<8x41xf32, #tpu.memory_space<vmem>>, vector<8x1xf32>
    %318 = vector.broadcast %317 : vector<8x1xf32> to vector<8x256xf32>
    %319 = arith.mulf %316, %318 : vector<8x256xf32>
    %320 = arith.addf %311, %319 : vector<8x256xf32>
    %321 = vector.extract_strided_slice %3 {offsets = [0, 64], sizes = [8, 256], strides = [1, 1]} : vector<8x324xf32> to vector<8x256xf32>
    %cst_83 = arith.constant 0.000000e+00 : f32
    %322 = vector.shape_cast %29 : vector<1x256xi1> to vector<1x256xi1>
    %323 = vector.broadcast %322 : vector<1x256xi1> to vector<8x256xi1>
    %324 = vector.broadcast %cst_83 : f32 to vector<8x256xf32>
    %325 = arith.select %323, %321, %324 : vector<8x256xi1>, vector<8x256xf32>
    %c0_84 = arith.constant 0 : index
    %c30 = arith.constant 30 : index
    %326 = vector.load %arg3[%c0_84, %c30] : memref<8x41xf32, #tpu.memory_space<vmem>>, vector<8x1xf32>
    %327 = vector.broadcast %326 : vector<8x1xf32> to vector<8x256xf32>
    %328 = arith.mulf %325, %327 : vector<8x256xf32>
    %329 = arith.addf %320, %328 : vector<8x256xf32>
    %330 = vector.extract_strided_slice %3 {offsets = [0, 65], sizes = [8, 256], strides = [1, 1]} : vector<8x324xf32> to vector<8x256xf32>
    %cst_85 = arith.constant 0.000000e+00 : f32
    %331 = vector.shape_cast %38 : vector<1x256xi1> to vector<1x256xi1>
    %332 = vector.broadcast %331 : vector<1x256xi1> to vector<8x256xi1>
    %333 = vector.broadcast %cst_85 : f32 to vector<8x256xf32>
    %334 = arith.select %332, %330, %333 : vector<8x256xi1>, vector<8x256xf32>
    %c0_86 = arith.constant 0 : index
    %c31 = arith.constant 31 : index
    %335 = vector.load %arg3[%c0_86, %c31] : memref<8x41xf32, #tpu.memory_space<vmem>>, vector<8x1xf32>
    %336 = vector.broadcast %335 : vector<8x1xf32> to vector<8x256xf32>
    %337 = arith.mulf %334, %336 : vector<8x256xf32>
    %338 = arith.addf %329, %337 : vector<8x256xf32>
    %339 = vector.extract_strided_slice %3 {offsets = [0, 66], sizes = [8, 256], strides = [1, 1]} : vector<8x324xf32> to vector<8x256xf32>
    %c0_87 = arith.constant 0 : index
    %c32 = arith.constant 32 : index
    %340 = vector.load %arg3[%c0_87, %c32] : memref<8x41xf32, #tpu.memory_space<vmem>>, vector<8x1xf32>
    %341 = vector.broadcast %340 : vector<8x1xf32> to vector<8x256xf32>
    %342 = arith.mulf %339, %341 : vector<8x256xf32>
    %343 = arith.addf %338, %342 : vector<8x256xf32>
    %344 = vector.extract_strided_slice %3 {offsets = [0, 67], sizes = [8, 256], strides = [1, 1]} : vector<8x324xf32> to vector<8x256xf32>
    %cst_88 = arith.constant 0.000000e+00 : f32
    %345 = vector.shape_cast %47 : vector<1x256xi1> to vector<1x256xi1>
    %346 = vector.broadcast %345 : vector<1x256xi1> to vector<8x256xi1>
    %347 = vector.broadcast %cst_88 : f32 to vector<8x256xf32>
    %348 = arith.select %346, %344, %347 : vector<8x256xi1>, vector<8x256xf32>
    %c0_89 = arith.constant 0 : index
    %c33 = arith.constant 33 : index
    %349 = vector.load %arg3[%c0_89, %c33] : memref<8x41xf32, #tpu.memory_space<vmem>>, vector<8x1xf32>
    %350 = vector.broadcast %349 : vector<8x1xf32> to vector<8x256xf32>
    %351 = arith.mulf %348, %350 : vector<8x256xf32>
    %352 = arith.addf %343, %351 : vector<8x256xf32>
    %353 = vector.extract_strided_slice %3 {offsets = [0, 68], sizes = [8, 256], strides = [1, 1]} : vector<8x324xf32> to vector<8x256xf32>
    %cst_90 = arith.constant 0.000000e+00 : f32
    %354 = vector.shape_cast %56 : vector<1x256xi1> to vector<1x256xi1>
    %355 = vector.broadcast %354 : vector<1x256xi1> to vector<8x256xi1>
    %356 = vector.broadcast %cst_90 : f32 to vector<8x256xf32>
    %357 = arith.select %355, %353, %356 : vector<8x256xi1>, vector<8x256xf32>
    %c0_91 = arith.constant 0 : index
    %c34 = arith.constant 34 : index
    %358 = vector.load %arg3[%c0_91, %c34] : memref<8x41xf32, #tpu.memory_space<vmem>>, vector<8x1xf32>
    %359 = vector.broadcast %358 : vector<8x1xf32> to vector<8x256xf32>
    %360 = arith.mulf %357, %359 : vector<8x256xf32>
    %361 = arith.addf %352, %360 : vector<8x256xf32>
    %c0_92 = arith.constant 0 : index
    %c37 = arith.constant 37 : index
    %362 = vector.load %arg3[%c0_92, %c37] : memref<8x41xf32, #tpu.memory_space<vmem>>, vector<8x1xf32>
    %c0_93 = arith.constant 0 : index
    %c40 = arith.constant 40 : index
    %363 = vector.load %arg3[%c0_93, %c40] : memref<8x41xf32, #tpu.memory_space<vmem>>, vector<8x1xf32>
    %364 = vector.broadcast %362 : vector<8x1xf32> to vector<8x256xf32>
    %365 = arith.mulf %361, %364 : vector<8x256xf32>
    %366 = vector.broadcast %363 : vector<8x1xf32> to vector<8x256xf32>
    %367 = arith.addf %365, %366 : vector<8x256xf32>
    %cst_94 = arith.constant 0.000000e+00 : f32
    %cst_95 = arith.constant 6.000000e+00 : f32
    %368 = vector.broadcast %cst_94 : f32 to vector<8x256xf32>
    %369 = arith.maximumf %368, %367 : vector<8x256xf32>
    %370 = vector.broadcast %cst_95 : f32 to vector<8x256xf32>
    %371 = arith.minimumf %370, %369 : vector<8x256xf32>
    %372 = arith.addf %155, %371 : vector<8x256xf32>
    %c0_96 = arith.constant 0 : index
    %c0_97 = arith.constant 0 : index
    %c0_98 = arith.constant 0 : index
    %373 = vector.load %arg4[%c0_96, %c0_97, %c0_98] : memref<1x8x256xf32, #tpu.memory_space<vmem>>, vector<1x8x256xf32>
    %374 = vector.shape_cast %373 : vector<1x8x256xf32> to vector<8x256xf32>
    %375 = vector.shape_cast %372 : vector<8x256xf32> to vector<1x8x256xf32>
    tpu.vector_store %arg4[%c0_96, %c0_97, %c0_98], %375 {strides = array<i32>} : memref<1x8x256xf32, #tpu.memory_space<vmem>>, vector<1x8x256xf32>,
    return
  }
  func.func @transform_0(%arg0: i32, %arg1: i32) -> (i32, i32, i32) {
    %c0_i32 = arith.constant 0 : i32
    %c0_i32_0 = arith.constant 0 : i32
    return %arg0, %arg1, %c0_i32 : i32, i32, i32
  }
  func.func @transform_1(%arg0: i32, %arg1: i32) -> (i32, i32) {
    %c0_i32 = arith.constant 0 : i32
    %c0_i32_0 = arith.constant 0 : i32
    return %arg1, %c0_i32 : i32, i32
  }
  func.func @transform_2(%arg0: i32, %arg1: i32) -> (i32, i32, i32) {
    %c0_i32 = arith.constant 0 : i32
    %c0_i32_0 = arith.constant 0 : i32
    return %arg0, %arg1, %c0_i32 : i32, i32, i32
  }
}

</mosaic_0001>

<bundles_post_ra>
// kernel: tpu_custom_call.1
= control target key start
LH: loop header
LB: loop body
LE: loop exit
PB: predicated region body
PF: predicated region fallthrough
CT: control target
= control target key end

     0   :  { %7 = vsyncpa [#allocation3], 0  ;;  %s2401_s0 = inlined_call_operand.hbm [shape: f32[2,8,256], index: 0, kind: input, shape index: {}]   ;;  %s2402_s1 = inlined_call_operand.hbm [shape: f32[8,41], index: 1, kind: input, shape index: {}]   ;;  %s2403_s2 = inlined_call_operand.hbm [shape: f32[2,8,256], index: 2, kind: output, shape index: {}]  }
   0x1   :  { %9 = vsyncpa [#allocation3 + $0x1], 0 }
   0x2   :  { %10 = vsyncpa [#allocation6], 0 }
   0x3   :  { %11 = vsyncpa [#allocation4], 0 }
   0x4   :  { %13 = vsyncpa [#allocation4 + $0x1], 0  ;;  %s1579_s9 = smov 0   ;;  %s1581_s10 = smov 0  }
   0x5   :  { %s1583_s11 = smov 0   ;;  %s1585_s12 = smov 0  }
   0x6   :  { %s1587_s13 = smov 0   ;;  %s1589_s14 = smov 0  }
   0x7 LB: > { %s1149_s15 = sadd.s32 4294967295, %s1493_s14   ;;  %s1150_s16 = sadd.s32 4294967294, %s1493_s14   ;;  %s1493_s14 = sphi %s1589_s14, %s19_s14   ;;  %s1489_s13 = sphi %s1587_s13, %s2447_s13   ;;  %s1485_s12 = sphi %s1585_s12, %s2446_s12   ;;  %s1481_s11 = sphi %s1583_s11, %s2445_s11   ;;  %s1477_s10 = sphi %s1581_s10, %s2444_s10   ;;  %s1473_s9 = sphi %s1579_s9, %s2443_s9  }
   0x8   : > { %p53_p0 = scmp.ne.s32.totalorder %s1477_s10, %s1473_s9  ;;  %p1613_p1 = scmp.eq.s32.totalorder %s1149_s15, 0 }
   0x9   : > { %p1617_p2 = scmp.eq.s32.totalorder %s1149_s15, 1  ;;  %p111_p3 = scmp.eq.s32.totalorder %s1150_s16, 1 }
   0xa   : > { %s2414_s17 = scalar_select %p1613_p1, 1, 0 }
   0xb   : > { %s2415_s18 = scalar_select %p1617_p2, 1, 0 }
   0xc   : > { %p1623_p4 = por %p1613_p1, %p53_p0  ;;  %p1151_p5 = scmp.ge.s32.totalorder %s1493_s14, 1 }
   0xd   : > { %p1628_p6 = por %p111_p3, %p53_p0  ;;  %p118_p7 = scmp.lt.s32.totalorder %s1493_s14, 3 }
   0xe   : > { %s2416_s19 = scalar_select %p1623_p4, 1, 0 }
   0xf   : > { %s2417_s20 = scalar_select %p1628_p6, 1, 0 }
  0x10   : > { %p1633_p8 = pnand %p1151_p5, %p118_p7  ;;  %s1495_s22 = smov [#allocation5]  }
  0x11   : > { %s133_s23 = sshll.u32 %s1495_s22, 4  ;;  %s31_s25 = sadd.s32 1, %s1489_s13  ;;  %s134_s23 = int_to_ptr.vmem [resolvable:$true] %s133_s23 }
  0x12   : > { %s2418_s21 = scalar_select %p1633_p8, 1, 0 }
  0x13   : > { %p1176_p10 = pneg %p1633_p8  ;;  %s40_s26 = sadd.s32 1, %s1481_s11 }
  0x14   : > { %p1648_p12 = scmp.ge.s32.totalorder %s31_s25, 2  ;;  %s1349_s30 = scalar_lea.hbm %s2402_s1, 128 }
  0x15   : > { %p1642_p11 = pnand %p1176_p10, %p1613_p1  ;;  %p1350_p13 = scmp.ne.s32.totalorder %s2402_s1, %s1349_s30 }
  0x16   : > { %s2420_s27 = scalar_select %p1648_p12, 1, 0 }
  0x17   : > { %p1351_p0 = pneg %p1642_p11  ;;  %p1356_p7 = scmp.lt.u32.totalorder %s1349_s30, %s2402_s1 }
  0x19   : > { %p1352_p3 = pnand %p1351_p0, %p1350_p13 }
  0x1b   : > { %p1353_p5 = pneg %p1352_p3 }
  0x1d   : > { %p1358_p10 = pnand %p1356_p7, %p1353_p5 }
  0x1f   : > { %1361 = shalt.err (!%p1358_p10)
}
  0x20   : > { %s1362_s7 = scalar_lea.vmem %s134_s23, 128  ;;  %p1370_p4 = scmp.lt.s32.totalorder %s134_s23, %s134_s23 }
  0x21   : > { %p1363_p9 = scmp.ne.s32.totalorder %s134_s23, %s1362_s7  ;;  %p1371_p8 = scmp.lt.s32.totalorder %s1362_s7, %s1362_s7 }
  0x23   : > { %p1365_p6 = pnand %p1363_p9, %p1351_p0  ;;  %p1372_p2 = por %p1371_p8, %p1370_p4 }
  0x25   : > { %p1366_p1 = pneg %p1365_p6 }
  0x27   : > { %p1373_p12 = pnand %p1372_p2, %p1366_p1 }
  0x29   : > { %1376 = shalt.err (!%p1373_p12)
}
  0x2a   : > { %1179 = dma.hbm_to_vmem [thread:$0]  (!%p1642_p11), %s2402_s1, 128, %s134_s23, [#allocation6]  }
  0x2b   : > { %p2421_p4 = scmp.ne.s32.totalorder %s2420_s27, 0  ;;  %p47_p1 = scmp.ne.s32.totalorder %s1481_s11, %s1477_s10 }
  0x2c   : > { %p48_p2 = scmp.eq.s32.totalorder %s1493_s14, 0  ;;  %p1189_p6 = scmp.lt.s32.totalorder %s1493_s14, 2 }
  0x2d   : > { %s2449_s25 = smov (%p2421_p4, %s31_s25), 0  ;;  %p2422_p12 = scmp.ne.s32.totalorder %s2415_s18, 0 }
  0x2e   : > { %s35_s16 = ssub.s32 %s1489_s13, %s2449_s25  ;;  %p49_p9 = por %p48_p2, %p47_p1 }
  0x2f   : > { %p38_p8 = scmp.eq.s32.totalorder %s35_s16, 0  ;;  %p1680_p13 = por %p2422_p12, %p47_p1 }
  0x30   : > { %s144_s24 = sand.u32 1, %s1481_s11   ;;  %s1166_s27 = sshll.u32 %s1489_s13, 8 }
  0x31   : > { %s1688_s28 = scalar_select %p38_p8, %s1481_s11, %s40_s26  }
  0x32   : > { %s1154_s23 = sshll.u32 %s144_s24, 4  ;;  %s1694_s3 = scalar_lea.hbm %s2401_s0, %s1166_s27 }
  0x33   : > { %s148_s18 = scalar_lea.vmem [#allocation2], %s1154_s23  ;;  %p1698_p11 = pnand %p1189_p6, %p49_p9 }
  0x34   : > { %s158_s4 = sshll.u32 %s148_s18, 4  ;;  %s145_s26 = scalar_lea.sflag [#allocation3], %s144_s24  ;;  %s1696_s4 = int_to_ptr.vmem [resolvable:$true] %s158_s4 }
  0x35   : > { %s1377_s6 = scalar_lea.hbm %s1694_s3, 256  ;;  %p1379_p3 = pneg %p1698_p11 }
  0x36   : > { %p1378_p0 = scmp.ne.s32.totalorder %s1694_s3, %s1377_s6  ;;  %s1382_s15 = scalar_lea.hbm %s2401_s0, 512 }
  0x37   : > { %p1383_p10 = scmp.lt.u32.totalorder %s1694_s3, %s2401_s0  ;;  %p1384_p4 = scmp.lt.u32.totalorder %s1382_s15, %s1377_s6 }
  0x38   : > { %p1380_p5 = pnand %p1379_p3, %p1378_p0  ;;  %p1386_p2 = scmp.lt.u32.totalorder %s1377_s6, %s1694_s3 }
  0x39   : > { %p1385_p1 = por %p1384_p4, %p1383_p10 }
  0x3a   : > { %p1381_p7 = pneg %p1380_p5 }
  0x3b   : > { %p1387_p6 = por %p1386_p2, %p1385_p1 }
  0x3d   : > { %p1388_p8 = pnand %p1387_p6, %p1381_p7 }
  0x3f   : > { %1391 = shalt.err (!%p1388_p8)
}
  0x40   : > { %s1392_s24 = scalar_lea.vmem %s1696_s4, 256  ;;  %s1496_s27 = smov [#allocation2]  }
  0x41   : > { %p1393_p9 = scmp.ne.s32.totalorder %s1696_s4, %s1392_s24  ;;  %s1397_s29 = sshll.u32 %s1496_s27, 4  ;;  %s1398_s29 = int_to_ptr.vmem [resolvable:$false] %s1397_s29 }
  0x42   : > { %s1399_s30 = scalar_lea.vmem %s1398_s29, 512  ;;  %p1400_p5 = scmp.lt.s32.totalorder %s1696_s4, %s1398_s29 }
  0x43   : > { %p1395_p12 = pnand %p1393_p9, %p1379_p3  ;;  %p1401_p10 = scmp.lt.s32.totalorder %s1399_s30, %s1392_s24 }
  0x45   : > { %p1396_p0 = pneg %p1395_p12  ;;  %p1402_p4 = por %p1401_p10, %p1400_p5 }
  0x47   : > { %p1403_p1 = pnand %p1402_p4, %p1396_p0 }
  0x49   : > { %1406 = shalt.err (!%p1403_p1)
}
  0x4a   : > { %1183 = dma.hbm_to_vmem [thread:$0]  (!%p1698_p11), %s1694_s3, 256, %s1696_s4, %s145_s26  }
  0x4b   : > { %p2425_p7 = scmp.ne.s32.totalorder %s2418_s21, 0 }
  0x4d   : > { %167 = sbr.rel (%p2425_p7) target bundleno = 832 (0x340), region = 28 }
  0x54   : > { %s1730_s18 = sand.u32 1, %s1477_s10   ;;  %p2426_p3 = scmp.ne.s32.totalorder %s2416_s19, 0 }
  0x55   : > { %s1158_s6 = sshll.u32 %s1730_s18, 4  ;;  %s170_s7 = scalar_lea.sflag [#allocation3], %s1730_s18 }
  0x56   : > { %s173_s8 = scalar_lea.vmem [#allocation2], %s1158_s6 }
  0x57   : > { %1460 = dma.done.wait (%p2426_p3), %s170_s7, 256  }
  0x58   : > { %1462 = vsyncadd (%p2426_p3), %s170_s7, 4294967040  ;;  %p2427_p11 = scmp.ne.s32.totalorder %s2414_s17, 0 }
  0x5a   : > { %1464 = dma.done.wait (%p2427_p11), [#allocation6], 128  }
  0x5b   : > { %1466 = vsyncadd (%p2427_p11), [#allocation6], 4294967168  ;;  %v1497_v0 = vmov 0   ;;  %v1498_v1 = vmov 38   ;;  %v1744_v2 = vld [vmem:[#allocation5] sm:$0xff]  ;;  %s1499_s21 = smov 34  }
  0x5c   : > { %1307 = vset.pattern.permute.xlu1 %v1497_v0  ;;  %1309 = vset.pattern.permute.xlu0 %v1498_v1  ;;  %v198_v3 = vld [vmem:[%s173_s8] sm:$0xff]  ;;  %v199_v4 = vld [vmem:[%s173_s8 + $0x8] sm:$0xff]  ;;  %v1500_v5 = vmov 35   ;;  %v1501_v6 = vmov 1   ;;  %v1502_v7 = vmov 2   ;;  %v1503_v8 = vmov 12  }
  0x5d   : > { %275 = vperm.xlu1 %1307, %v1744_v2   ;;  %202 = vrot.lane.b32.xlu0 %v198_v3, %s1499_s21  ;;  %v1504_v9 = vmov 3   ;;  %v1505_v10 = vmov 17   ;;  %v1506_v11 = vmov 22   ;;  %v1507_v12 = vmov 4   ;;  %s1521_s17 = smov 111   ;;  %s1522_s19 = smov 109  }
  0x5e   : > { %v1508_v13 = vmov 27   ;;  %v1509_v14 = vmov 5   ;;  %v1510_v15 = vmov 32   ;;  %v1511_v16 = vmov 8   ;;  %s1523_s3 = smov 95   ;;  %s1524_s4 = smov 93  }
  0x5f   : > { %v1512_v17 = vmov 6   ;;  %v1513_v18 = vmov 10   ;;  %v1514_v19 = vmov 13   ;;  %v1515_v20 = vmov 11   ;;  %s1525_s5 = smov 127   ;;  %s1526_s26 = smov 125  }
  0x60   : > { %v1516_v21 = vmov 15   ;;  %v1517_v22 = vmov 14   ;;  %v1518_v23 = vmov 16   ;;  %v1519_v24 = vmov 19   ;;  %s1527_s15 = smov 124   ;;  %s1528_s16 = smov 112  }
  0x61   : > { %1308 = vset.pattern.permute.xlu1 %v1500_v5  ;;  %204 = vrot.lane.b32.xlu0 %v199_v4, %s1499_s21  ;;  %v1520_v25 = vmov 18   ;;  %vm206_vm0 = vcmask 277504   ;;  %s1529_s23 = smov 110   ;;  %v1530_v38 = vmov 23   ;;  %s1531_s24 = smov 126   ;;  %v1532_v43 = vmov 20  }
  0x62   : > { %285 = vperm.xlu1 %1308, %v1744_v2   ;;  %s1533_s27 = smov 108   ;;  %v1534_v46 = vmov 21   ;;  %s1535_s29 = smov 96   ;;  %v1537_v53 = vmov 28   ;;  %v213_v3 = vlaneseq  ;;  %v1541_v4 = vmov 30  }
  0x63   : > { %s1536_s30 = smov 94   ;;  %s1538_s7 = smov 92   ;;  %vm319_vm1 = vcmask 908288   ;;  %vm388_vm3 = vcmask 777216   ;;  %vm367_vm4 = vcmask 891904   ;;  %vm651_vm7 = vcmask 916480  }
  0x64   : > { %s1539_s8 = smov 80   ;;  %vm432_vm8 = vcmask 760832   ;;  %vm350_vm10 = vcmask 900096   ;;  %vm561_vm11 = vcmask 1039360   ;;  %vm419_vm12 = vcmask 769024  }
  0x65   : > { %292 = vperm.xlu0 %1309, %v1744_v2   ;;  %vm605_vm14 = vcmask 1022976  }
  0x66   : > { %1310 = vset.pattern.permute.xlu1 %v1501_v6  ;;  %v1884_v6 = vand.u32 127, %v213_v3 }
  0x67   : > { %327 = vperm.xlu1 %1310, %v1744_v2  }
  0x69   : > { %1311 = vset.pattern.permute.xlu0 %v1502_v7 }
  0x6a   : > { %335 = vperm.xlu0 %1311, %v1744_v2  }
  0x6b   : > { %1313 = vset.pattern.permute.xlu1 %v1503_v8  ;;  %v1542_v8 = vmov 24  }
  0x6c   : > { %577 = vperm.xlu1 %1313, %v1744_v2  }
  0x6e   : > { %1312 = vset.pattern.permute.xlu0 %v1504_v9  ;;  %v215_v9 = vadd.s32 128, %v1884_v6 }
  0x6f   : > { %375 = vperm.xlu0 %1312, %v1744_v2  }
  0x70   : > { %1314 = vset.pattern.permute.xlu1 %v1505_v10 }
  0x71   : > { %675 = vperm.xlu1 %1314, %v1744_v2  }
  0x73   : > { %1316 = vset.pattern.permute.xlu0 %v1506_v11  ;;  %v1544_v11 = vmov 9  }
  0x74   : > { %755 = vperm.xlu0 %1316, %v1744_v2  }
  0x75   : > { %1315 = vset.pattern.permute.xlu1 %v1507_v12 }
  0x76   : > { %396 = vperm.xlu1 %1315, %v1744_v2  }
  0x78   : > { %1318 = vset.pattern.permute.xlu0 %v1508_v13  ;;  %v1899_v13 = vand.u32 15, %v215_v9 }
  0x79   : > { %835 = vperm.xlu0 %1318, %v1744_v2  }
  0x7a   : > { %1317 = vset.pattern.permute.xlu1 %v1509_v14  ;;  %v2013_v9 = vadd.s32 1, %v1899_v13 }
  0x7b   : > { %404 = vperm.xlu1 %1317, %v1744_v2  }
  0x7c   : > { %vm261_vm6 = vcmp.lt.s32.totalorder %v2013_v9, 16 }
  0x7d   : > { %1320 = vset.pattern.permute.xlu0 %v1510_v15  ;;  %v1907_v15 = vadd.s32 4294967295, %v1899_v13 }
  0x7e   : > { %928 = vperm.xlu0 %1320, %v1744_v2  }
  0x7f   : > { %1319 = vset.pattern.permute.xlu1 %v1511_v16  ;;  %vm251_vm2 = vcmp.ge.s32.totalorder %v1907_v15, 0 }
  0x80   : > { %469 = vperm.xlu1 %1319, %v1744_v2  }
  0x82   : > { %1321 = vset.pattern.permute.xlu0 %v1512_v17 }
  0x83   : > { %440 = vperm.xlu0 %1321, %v1744_v2  }
  0x84   : > { %1322 = vset.pattern.permute.xlu1 %v1513_v18 }
  0x85   : > { %548 = vperm.xlu1 %1322, %v1744_v2  }
  0x87   : > { %1324 = vset.pattern.permute.xlu0 %v1514_v19 }
  0x88   : > { %613 = vperm.xlu0 %1324, %v1744_v2  }
  0x89   : > { %1323 = vset.pattern.permute.xlu1 %v1515_v20 }
  0x8a   : > { %569 = vperm.xlu1 %1323, %v1744_v2  }
  0x8c   : > { %1326 = vset.pattern.permute.xlu0 %v1516_v21 }
  0x8d   : > { %659 = vperm.xlu0 %1326, %v1744_v2  }
  0x8e   : > { %1325 = vset.pattern.permute.xlu1 %v1517_v22 }
  0x8f   : > { %638 = vperm.xlu1 %1325, %v1744_v2  }
  0x91   : > { %1327 = vset.pattern.permute.xlu0 %v1518_v23  ;;  %v1547_v23 = vmov 25  }
  0x92   : > { %667 = vperm.xlu0 %1327, %v1744_v2  }
  0x93   : > { %1329 = vset.pattern.permute.xlu1 %v1519_v24 }
  0x96   : > { %1328 = vset.pattern.permute.xlu0 %v1520_v25 }
  0xcf   : > { %v203_v26 = vpop.permute.xlu0 %202 }
  0xd0   : > { %v1770_v27 = vsel %vm206_vm0, 0.0, %v203_v26 }
  0xd1   : > { %313 = vrot.lane.b32.xlu1 %v1770_v27, %s1521_s17 }
  0xd3   : > { %v205_v28 = vpop.permute.xlu0 %204 }
  0xd4   : > { %v1774_v29 = vsel %vm206_vm0, %v203_v26, %v205_v28  ;;  %v1777_v30 = vsel %vm206_vm0, %v205_v28, 0.0 }
  0xd5   : > { %317 = vrot.lane.b32.xlu0 %v1777_v30, %s1521_s17  ;;  %315 = vrot.lane.b32.xlu1 %v1774_v29, %s1521_s17  ;;  %s1540_s17 = smov 79  }
  0xd9   : > { %363 = vrot.lane.b32.xlu0 %v1774_v29, %s1522_s19  ;;  %361 = vrot.lane.b32.xlu1 %v1770_v27, %s1522_s19 }
  0xdc   : > { %v1791_v31 = vpop.permute.xlu1 %275 }
  0xdd   : > { %384 = vrot.lane.b32.xlu0 %v1774_v29, %s1523_s3  ;;  %365 = vrot.lane.b32.xlu1 %v1777_v30, %s1522_s19  ;;  %2428 = vst [vmem:[#allocation11_spill] sm:$0xff] %v1791_v31  ;;  %s1543_s19 = smov 77  }
  0xe1   : > { %386 = vrot.lane.b32.xlu0 %v1777_v30, %s1523_s3  ;;  %382 = vrot.lane.b32.xlu1 %v1770_v27, %s1523_s3  ;;  %v1795_v32 = vpop.permute.xlu1 %285  ;;  %s1545_s3 = smov 78  }
  0xe2   : > { %2429 = vst [vmem:[#allocation12_spill] sm:$0xff] %v1795_v32 }
  0xe4   : > { %v1799_v33 = vpop.permute.xlu0 %292 }
  0xe5   : > { %426 = vrot.lane.b32.xlu0 %v1770_v27, %s1524_s4  ;;  %428 = vrot.lane.b32.xlu1 %v1774_v29, %s1524_s4  ;;  %2430 = vst [vmem:[#allocation13_spill] sm:$0xff] %v1799_v33 }
  0xe6   : > { %v1801_v34 = vpop.permute.xlu1 %327 }
  0xe9   : > { %559 = vrot.lane.b32.xlu0 %v1777_v30, %s1525_s5  ;;  %430 = vrot.lane.b32.xlu1 %v1777_v30, %s1524_s4  ;;  %v336_v35 = vpop.permute.xlu0 %335  ;;  %s1546_s4 = smov 76  }
  0xea   : > { %v340_v37 = vmul.f32 %v336_v35, %v1777_v30  ;;  %v338_v47 = vmul.f32 %v336_v35, %v1770_v27  ;;  %v339_v49 = vmul.f32 %v336_v35, %v1774_v29 }
  0xeb   : > { %v578_v36 = vpop.permute.xlu1 %577 }
  0xec   : > { %v581_v39 = vmul.f32 %v578_v36, %v1774_v29  ;;  %v580_v58 = vmul.f32 %v578_v36, %v1770_v27  ;;  %v582_v60 = vmul.f32 %v578_v36, %v1777_v30  ;;  %v1548_v36 = vmov 26  }
  0xed   : > { %603 = vrot.lane.b32.xlu0 %v1777_v30, %s1526_s26  ;;  %555 = vrot.lane.b32.xlu1 %v1770_v27, %s1525_s5 }
  0xee   : > { %v1826_v44 = vpop.permute.xlu0 %375 }
  0xf0   : > { %v676_v40 = vpop.permute.xlu1 %675 }
  0xf1   : > { %628 = vrot.lane.b32.xlu0 %v1777_v30, %s1527_s15  ;;  %557 = vrot.lane.b32.xlu1 %v1774_v29, %s1525_s5  ;;  %v678_v41 = vmul.f32 %v676_v40, %v1770_v27  ;;  %v680_v42 = vmul.f32 %v676_v40, %v1777_v30  ;;  %v679_v63 = vmul.f32 %v676_v40, %v1774_v29  ;;  %s1549_s5 = smov 64  }
  0xf3   : > { %v1836_v48 = vpop.permute.xlu0 %755 }
  0xf4   : > { %v758_v51 = vmul.f32 %v1836_v48, %v1770_v27  ;;  %v760_v54 = vmul.f32 %v1836_v48, %v1777_v30  ;;  %v759_v26 = vmul.f32 %v1836_v48, %v1774_v29 }
  0xf5   : > { %647 = vrot.lane.b32.xlu0 %v1774_v29, %s1528_s16  ;;  %599 = vrot.lane.b32.xlu1 %v1770_v27, %s1526_s26  ;;  %v1830_v45 = vpop.permute.xlu1 %396 }
  0xf8   : > { %v1852_v57 = vpop.permute.xlu0 %835 }
  0xf9   : > { %697 = vperm.xlu0 %1328, %v1744_v2   ;;  %601 = vrot.lane.b32.xlu1 %v1774_v29, %s1526_s26  ;;  %v838_v12 = vmul.f32 %v1852_v57, %v1770_v27  ;;  %v840_v17 = vmul.f32 %v1852_v57, %v1777_v30  ;;  %s1551_s26 = smov 63  }
  0xfa   : > { %v405_v50 = vpop.permute.xlu1 %404 }
  0xfb   : > { %v407_v52 = vmul.f32 %v405_v50, %v1770_v27  ;;  %v408_v55 = vmul.f32 %v405_v50, %v1774_v29  ;;  %v409_v56 = vmul.f32 %v405_v50, %v1777_v30 }
  0xfd   : > { %624 = vrot.lane.b32.xlu1 %v1770_v27, %s1527_s15  ;;  %348 = vrot.lane.b32.xlu0 %v340_v37, %s1529_s23  ;;  %v1861_v59 = vpop.permute.xlu0 %928 }
  0xfe   : > { %1332 = vset.pattern.permute.xlu0 %v1530_v38 }
  0xff   : > { %v1864_v61 = vpop.permute.xlu1 %469 }
 0x101   : > { %626 = vrot.lane.b32.xlu1 %v1774_v29, %s1527_s15  ;;  %588 = vrot.lane.b32.xlu0 %v581_v39, %s1531_s24  ;;  %s1553_s15 = smov 61  }
 0x102   : > { %v1869_v62 = vpop.permute.xlu0 %440 }
 0x104   : > { %v1874_v0 = vpop.permute.xlu1 %548 }
 0x105   : > { %645 = vrot.lane.b32.xlu1 %v1770_v27, %s1528_s16  ;;  %684 = vrot.lane.b32.xlu0 %v678_v41, %s1529_s23  ;;  %v1550_v41 = vmov 29  }
 0x107   : > { %v1878_v1 = vpop.permute.xlu0 %613 }
 0x109   : > { %718 = vperm.xlu1 %1329, %v1744_v2   ;;  %688 = vrot.lane.b32.xlu0 %v680_v42, %s1529_s23  ;;  %v1881_v5 = vpop.permute.xlu1 %569  ;;  %v1552_v42 = vmov 34  }
 0x10c   : > { %v1888_v7 = vpop.permute.xlu0 %659 }
 0x10d   : > { %1330 = vset.pattern.permute.xlu1 %v1532_v43  ;;  %704 = vrot.lane.b32.xlu0 %v1770_v27, %s1533_s27 }
 0x10e   : > { %739 = vperm.xlu1 %1330, %v1744_v2   ;;  %v1893_v10 = vpop.permute.xlu1 %638 }
 0x111   : > { %708 = vrot.lane.b32.xlu0 %v1777_v30, %s1533_s27  ;;  %v1902_v14 = vpop.permute.xlu0 %667 }
 0x112   : > { %649 = vrot.lane.b32.xlu1 %v1777_v30, %s1528_s16  ;;  %s1555_s16 = smov 62  }
 0x113   : > { %1331 = vset.pattern.permute.xlu1 %v1534_v46 }
 0x115   : > { %727 = vrot.lane.b32.xlu0 %v1774_v29, %s1535_s29 }
 0x116   : > { %344 = vrot.lane.b32.xlu1 %v338_v47, %s1529_s23 }
 0x119   : > { %777 = vperm.xlu0 %1332, %v1744_v2  }
 0x11a   : > { %346 = vrot.lane.b32.xlu1 %v339_v49, %s1529_s23  ;;  %v2408_v49 = vmov 40  }
 0x11d   : > { %764 = vrot.lane.b32.xlu0 %v758_v51, %s1536_s30  ;;  %v472_v51 = vmul.f32 %v1864_v61, %v1770_v27 }
 0x11e   : > { %413 = vrot.lane.b32.xlu1 %v407_v52, %s1536_s30  ;;  %1336 = vset.pattern.permute.xlu0 %v1537_v53  ;;  %v474_v52 = vmul.f32 %v1864_v61, %v1777_v30 }
 0x121   : > { %768 = vrot.lane.b32.xlu0 %v760_v54, %s1536_s30 }
 0x122   : > { %415 = vrot.lane.b32.xlu1 %v408_v55, %s1536_s30  ;;  %v931_v55 = vmul.f32 %v1861_v59, %v1770_v27 }
 0x125   : > { %784 = vrot.lane.b32.xlu0 %v1770_v27, %s1538_s7 }
 0x126   : > { %417 = vrot.lane.b32.xlu1 %v409_v56, %s1536_s30 }
 0x129   : > { %788 = vrot.lane.b32.xlu0 %v1777_v30, %s1538_s7 }
 0x12a   : > { %586 = vrot.lane.b32.xlu1 %v580_v58, %s1531_s24  ;;  %v1999_v58 = vand.u32 15, %v1884_v6 }
 0x12d   : > { %807 = vrot.lane.b32.xlu0 %v1774_v29, %s1539_s8 }
 0x12e   : > { %590 = vrot.lane.b32.xlu1 %v582_v60, %s1531_s24 }
 0x131   : > { %857 = vperm.xlu0 %1336, %v1744_v2  }
 0x132   : > { %686 = vrot.lane.b32.xlu1 %v679_v63, %s1529_s23  ;;  %v933_v63 = vmul.f32 %v1861_v59, %v1777_v30  ;;  %s1557_s23 = smov 60  }
 0x135   : > { %451 = vrot.lane.b32.xlu0 %v1777_v30, %s1540_s17 }
 0x136   : > { %747 = vperm.xlu1 %1331, %v1744_v2   ;;  %1338 = vset.pattern.permute.xlu0 %v1541_v4  ;;  %v2010_v4 = vadd.s32 1, %v1999_v58 }
 0x138   : > { %vm260_vm5 = vcmp.lt.s32.totalorder %v2010_v4, 16 }
 0x139   : > { %899 = vperm.xlu0 %1338, %v1744_v2  }
 0x13a   : > { %706 = vrot.lane.b32.xlu1 %v1774_v29, %s1533_s27  ;;  %s1167_s27 = sshll.u32 %s1485_s12, 8  ;;  %s1563_s12 = smov [#allocation7]  }
 0x13b   : > { %1333 = vset.pattern.permute.xlu1 %v1542_v8  ;;  %v1556_v8 = vmov 7  }
 0x13d   : > { %495 = vrot.lane.b32.xlu0 %v1777_v30, %s1543_s19 }
 0x13e   : > { %725 = vrot.lane.b32.xlu1 %v1770_v27, %s1535_s29  ;;  %1341 = vset.pattern.permute.xlu0 %v1544_v11 }
 0x141   : > { %844 = vrot.lane.b32.xlu0 %v838_v12, %s1545_s3 }
 0x142   : > { %729 = vrot.lane.b32.xlu1 %v1777_v30, %s1535_s29 }
 0x143   : > { %v1909_v16 = vpop.permute.xlu1 %313 }
 0x145   : > { %848 = vrot.lane.b32.xlu0 %v840_v17, %s1545_s3 }
 0x146   : > { %798 = vperm.xlu1 %1333, %v1744_v2  }
 0x147   : > { %v1916_v18 = vpop.permute.xlu1 %315  ;;  %v318_v19 = vpop.permute.xlu0 %317 }
 0x148   : > { %v321_v20 = vsel %vm319_vm1, %v1916_v18, %v318_v19 }
 0x149   : > { %v1922_v21 = vsel %vm251_vm2, %v321_v20, 0.0  ;;  %864 = vrot.lane.b32.xlu0 %v1770_v27, %s1546_s4 }
 0x14a   : > { %v1928_v22 = vmul.f32 %v1902_v14, %v1922_v21  ;;  %1334 = vset.pattern.permute.xlu1 %v1547_v23 }
 0x14b   : > { %v1930_v24 = vpop.permute.xlu1 %361  ;;  %819 = vperm.xlu1 %1334, %v1744_v2   ;;  %v1933_v25 = vpop.permute.xlu0 %363 }
 0x14c   : > { %v368_v12 = vsel %vm367_vm4, %v1930_v24, %v1933_v25 }
 0x14d   : > { %868 = vrot.lane.b32.xlu0 %v1777_v30, %s1546_s4  ;;  %v372_v23 = vsel %vm260_vm5, %v368_v12, 0.0  ;;  %v2065_v12 = vadd.s32 4294967295, %v1999_v58 }
 0x14e   : > { %v378_v31 = vmul.f32 %v1826_v44, %v372_v23 }
 0x14f   : > { %v1939_v28 = vpop.permute.xlu1 %365  ;;  %766 = vrot.lane.b32.xlu1 %v759_v26, %s1536_s30  ;;  %v1942_v35 = vpop.permute.xlu0 %384  ;;  %v839_v26 = vmul.f32 %v1852_v57, %v1774_v29  ;;  %vm250_vm9 = vcmp.ge.s32.totalorder %v2065_v12, 0 }
 0x150   : > { %1335 = vset.pattern.permute.xlu1 %v1548_v36  ;;  %v369_v17 = vsel %vm367_vm4, %v1933_v25, %v1939_v28  ;;  %vm592_vm4 = vcmask 1031168  }
 0x151   : > { %887 = vrot.lane.b32.xlu0 %v1774_v29, %s1549_s5  ;;  %v373_v24 = vsel %vm261_vm6, %v369_v17, 0.0 }
 0x153   : > { %v1946_v37 = vpop.permute.xlu1 %382  ;;  %827 = vperm.xlu1 %1335, %v1744_v2   ;;  %v387_v38 = vpop.permute.xlu0 %386 }
 0x154   : > { %v1951_v39 = vsel %vm388_vm3, %v1942_v35, %v387_v38 }
 0x155   : > { %505 = vperm.xlu0 %1341, %v1744_v2  }
 0x157   : > { %v1954_v40 = vpop.permute.xlu1 %428  ;;  %786 = vrot.lane.b32.xlu1 %v1774_v29, %s1538_s7  ;;  %v1964_v46 = vpop.permute.xlu0 %426 }
 0x158   : > { %2431 = vst [vmem:[#allocation14_spill] sm:$0xff] %v1954_v40  ;;  %1337 = vset.pattern.permute.xlu1 %v1550_v41  ;;  %v1558_v41 = vmov 31  }
 0x159   : > { %908 = vrot.lane.b32.xlu0 %v1774_v29, %s1551_s26 }
 0x15a   : > { %1343 = vset.pattern.permute.xlu0 %v1552_v42 }
 0x15b   : > { %v1960_v43 = vpop.permute.xlu1 %430  ;;  %805 = vrot.lane.b32.xlu1 %v1770_v27, %s1539_s8  ;;  %v1973_v48 = vpop.permute.xlu0 %559 }
 0x15d   : > { %985 = vperm.xlu0 %1343, %v1744_v2  }
 0x15f   : > { %v1967_v47 = vpop.permute.xlu1 %555  ;;  %809 = vrot.lane.b32.xlu1 %v1777_v30, %s1539_s8  ;;  %v1989_v54 = vpop.permute.xlu0 %603  ;;  %s2351_s8 = scalar_lea.hbm %s2403_s2, %s1167_s27 }
 0x161   : > { %952 = vrot.lane.b32.xlu0 %v1774_v29, %s1553_s15 }
 0x162   : > { %1348 = vset.pattern.permute.xlu0 %v2408_v49  ;;  %v433_v49 = vsel %vm432_vm8, %v1964_v46, %v1954_v40  ;;  %v331_v46 = vmul.f32 %v1801_v34, %v1922_v21 }
 0x163   : > { %v1976_v50 = vpop.permute.xlu1 %557  ;;  %447 = vrot.lane.b32.xlu1 %v1770_v27, %s1540_s17  ;;  %v2001_v60 = vpop.permute.xlu0 %628 }
 0x165   : > { %478 = vrot.lane.b32.xlu0 %v472_v51, %s1545_s3  ;;  %v1559_v51 = vmov 33  }
 0x167   : > { %v1985_v53 = vpop.permute.xlu1 %599  ;;  %449 = vrot.lane.b32.xlu1 %v1774_v29, %s1540_s17  ;;  %v648_v11 = vpop.permute.xlu0 %647  ;;  %s1411_s17 = sshll.u32 %s1563_s12, 4  ;;  %s1412_s17 = int_to_ptr.vmem [resolvable:$false] %s1411_s17 }
 0x169   : > { %482 = vrot.lane.b32.xlu0 %v474_v52, %s1545_s3 }
 0x16b   : > { %v1994_v56 = vpop.permute.xlu1 %601  ;;  %878 = vperm.xlu1 %1337, %v1744_v2  }
 0x16d   : > { %937 = vrot.lane.b32.xlu0 %v931_v55, %s1555_s16 }
 0x16f   : > { %v2005_v3 = vpop.permute.xlu1 %624  ;;  %491 = vrot.lane.b32.xlu1 %v1770_v27, %s1543_s19 }
 0x170   : > { %1339 = vset.pattern.permute.xlu1 %v1556_v8 }
 0x171   : > { %941 = vrot.lane.b32.xlu0 %v933_v63, %s1555_s16 }
 0x173   : > { %v2016_v6 = vpop.permute.xlu1 %626  ;;  %493 = vrot.lane.b32.xlu1 %v1774_v29, %s1543_s19  ;;  %s1413_s19 = scalar_lea.vmem %s1412_s17, 512 }
 0x175   : > { %971 = vrot.lane.b32.xlu0 %v1770_v27, %s1557_s23 }
 0x177   : > { %v646_v19 = vpop.permute.xlu1 %645  ;;  %461 = vperm.xlu1 %1339, %v1744_v2  }
 0x178   : > { %v2030_v20 = vsel %vm651_vm7, %v646_v19, %v648_v11  ;;  %v698_v25 = vpop.permute.xlu0 %697 }
 0x179   : > { %v2038_v28 = vmul.f32 %v698_v25, %v372_v23  ;;  %v2040_v36 = vmul.f32 %v698_v25, %v373_v24  ;;  %975 = vrot.lane.b32.xlu0 %v1777_v30, %s1557_s23 }
 0x17b   : > { %846 = vrot.lane.b32.xlu1 %v839_v26, %s1545_s3  ;;  %v320_v26 = vsel %vm319_vm1, %v1909_v16, %v1916_v18  ;;  %v389_v16 = vsel %vm388_vm3, %v1946_v37, %v1942_v35  ;;  %v437_v18 = vsel %vm260_vm5, %v433_v49, 0.0  ;;  %v2111_v37 = vsel %vm251_vm2, %v1951_v39, 0.0 }
 0x17c   : > { %v349_v38 = vpop.permute.xlu0 %348  ;;  %1340 = vset.pattern.permute.xlu1 %v1558_v41  ;;  %v2106_v35 = vsel %vm250_vm9, %v389_v16, 0.0  ;;  %v2119_v16 = vadd.s32 4294967294, %v1999_v58  ;;  %vm630_vm1 = vcmask 1014784  }
 0x17d   : > { %v399_v39 = vmul.f32 %v1830_v45, %v2106_v35 }
 0x17e   : > { %vm242_vm13 = vcmp.ge.s32.totalorder %v2119_v16, 0 }
 0x17f   : > { %920 = vperm.xlu1 %1340, %v1744_v2  }
 0x180   : > { %v2046_v42 = vpop.permute.xlu0 %588 }
 0x183   : > { %866 = vrot.lane.b32.xlu1 %v1774_v29, %s1546_s4 }
 0x184   : > { %v2050_v57 = vpop.permute.xlu0 %684  ;;  %1342 = vset.pattern.permute.xlu1 %v1559_v51  ;;  %v1560_v51 = vmov 36  }
 0x187   : > { %885 = vrot.lane.b32.xlu1 %v1770_v27, %s1549_s5 }
 0x188   : > { %v2054_v52 = vpop.permute.xlu1 %718  ;;  %v2056_v55 = vpop.permute.xlu0 %688 }
 0x18b   : > { %889 = vrot.lane.b32.xlu1 %v1777_v30, %s1549_s5 }
 0x18c   : > { %v2060_v63 = vpop.permute.xlu0 %704 }
 0x18d   : > { %v2062_v8 = vpop.permute.xlu1 %739 }
 0x18f   : > { %964 = vperm.xlu1 %1342, %v1744_v2  }
 0x190   : > { %v2068_v17 = vpop.permute.xlu0 %708 }
 0x191   : > { %v650_v19 = vpop.permute.xlu1 %649 }
 0x192   : > { %v2071_v25 = vsel %vm651_vm7, %v648_v11, %v650_v19  ;;  %v2086_v11 = vsel %vm250_vm9, %v320_v26, 0.0 }
 0x193   : > { %906 = vrot.lane.b32.xlu1 %v1770_v27, %s1551_s26  ;;  %v330_v26 = vmul.f32 %v1801_v34, %v2086_v11 }
 0x194   : > { %v2079_v41 = vpop.permute.xlu0 %727  ;;  %1344 = vset.pattern.permute.xlu1 %v1560_v51 }
 0x195   : > { %v345_v33 = vpop.permute.xlu1 %344 }
 0x197   : > { %910 = vrot.lane.b32.xlu1 %v1777_v30, %s1551_s26 }
 0x198   : > { %v2095_v19 = vpop.permute.xlu0 %777 }
 0x199   : > { %2432 = vst [vmem:[#allocation15_spill] sm:$0xff] %v2095_v19  ;;  %v2100_v51 = vmul.f32 %v2095_v19, %v437_v18  ;;  %v347_v32 = vpop.permute.xlu1 %346 }
 0x19a   : > { %v351_v49 = vsel %vm350_vm10, %v345_v33, %v347_v32  ;;  %v352_v21 = vsel %vm350_vm10, %v347_v32, %v349_v38  ;;  %v400_v33 = vmul.f32 %v1830_v45, %v2111_v37 }
 0x19b   : > { %2433 = vst [vmem:[#allocation16_spill] sm:$0xff] %v2100_v51  ;;  %v379_v51 = vmul.f32 %v1826_v44, %v373_v24  ;;  %v355_v19 = vadd.f32 %v351_v49, %v330_v26  ;;  %v356_v34 = vadd.f32 %v352_v21, %v331_v46  ;;  %513 = vperm.xlu1 %1344, %v1744_v2   ;;  %v2131_v46 = vadd.s32 4294967294, %v1899_v13 }
 0x19c   : > { %v562_v44 = vsel %vm561_vm11, %v1967_v47, %v1976_v50  ;;  %v1561_v26 = vmov 39   ;;  %v2137_v47 = vadd.s32 2, %v1999_v58  ;;  %v545_v21 = vsel %vm242_vm13, %v1770_v27, 0.0 }
 0x19d   : > { %v380_v40 = vadd.f32 %v378_v31, %v355_v19  ;;  %v381_v32 = vadd.f32 %v379_v51, %v356_v34  ;;  %v414_v38 = vpop.permute.xlu1 %413  ;;  %v566_v45 = vsel %vm250_vm9, %v562_v44, 0.0  ;;  %v443_v51 = vmul.f32 %v1869_v62, %v437_v18 }
 0x19e   : > { %vm243_vm15 = vcmp.ge.s32.totalorder %v2131_v46, 0  ;;  %v473_v58 = vmul.f32 %v1864_v61, %v1774_v29  ;;  %v572_v34 = vmul.f32 %v1881_v5, %v566_v45  ;;  %vm268_vm3 = vcmp.lt.s32.totalorder %v2137_v47, 16 }
 0x19f   : > { %950 = vrot.lane.b32.xlu1 %v1770_v27, %s1553_s15  ;;  %v401_v23 = vadd.f32 %v399_v39, %v380_v40  ;;  %v402_v24 = vadd.f32 %v400_v33, %v381_v32  ;;  %v563_v40 = vsel %vm561_vm11, %v1976_v50, %v1973_v48  ;;  %v606_v48 = vsel %vm605_vm14, %v1985_v53, %v1994_v56 }
 0x1a0   : > { %1345 = vset.pattern.permute.xlu1 %v1561_v26  ;;  %v567_v39 = vsel %vm251_vm2, %v563_v40, 0.0  ;;  %v2161_v33 = vadd.s32 2, %v1899_v13  ;;  %v551_v61 = vmul.f32 %v1874_v0, %v545_v21  ;;  %v610_v44 = vsel %vm260_vm5, %v606_v48, 0.0 }
 0x1a1   : > { %v416_v31 = vpop.permute.xlu1 %415  ;;  %v573_v13 = vmul.f32 %v1881_v5, %v567_v39  ;;  %v932_v40 = vmul.f32 %v1861_v59, %v1774_v29  ;;  %vm731_vm11 = vcmask 785408  }
 0x1a2   : > { %v420_v19 = vsel %vm419_vm12, %v414_v38, %v416_v31  ;;  %v631_v38 = vsel %vm630_vm1, %v2005_v3, %v2016_v6  ;;  %v574_v26 = vadd.f32 %v572_v34, %v551_v61  ;;  %v546_v3 = vsel %vm243_vm15, %v1774_v29, 0.0 }
 0x1a3   : > { %v424_v49 = vadd.f32 %v420_v19, %v401_v23  ;;  %954 = vrot.lane.b32.xlu1 %v1777_v30, %s1553_s15  ;;  %v607_v23 = vsel %vm605_vm14, %v1994_v56, %v1989_v54  ;;  %vm269_vm7 = vcmp.lt.s32.totalorder %v2161_v33, 16  ;;  %v552_v5 = vmul.f32 %v1874_v0, %v546_v3  ;;  %v2199_v0 = vpop.permute.xlu0 %764  ;;  %v2438_v33 = vld [vmem:[#allocation11_spill] sm:$0xff] }
 0x1a4   : > { %v616_v19 = vmul.f32 %v1878_v1, %v610_v44  ;;  %v632_v54 = vsel %vm630_vm1, %v2016_v6, %v2001_v60  ;;  %v1562_v61 = vmov 37   ;;  %vm811_vm14 = vcmask 654336  }
 0x1a5   : > { %v2156_v50 = vadd.f32 %v443_v51, %v424_v49  ;;  %v418_v18 = vpop.permute.xlu1 %417  ;;  %v611_v51 = vsel %vm261_vm6, %v607_v23, 0.0  ;;  %v656_v49 = vsel %vm242_vm13, %v2030_v20, 0.0  ;;  %v575_v60 = vadd.f32 %v573_v13, %v552_v5 }
 0x1a6   : > { %v421_v32 = vsel %vm419_vm12, %v416_v31, %v418_v18  ;;  %v636_v6 = vsel %vm269_vm7, %v632_v54, 0.0  ;;  %v617_v48 = vmul.f32 %v1878_v1, %v611_v51  ;;  %v662_v18 = vmul.f32 %v1888_v7, %v656_v49 }
 0x1a7   : > { %v2169_v53 = vadd.f32 %v421_v32, %v402_v24  ;;  %480 = vrot.lane.b32.xlu1 %v473_v58, %s1545_s3  ;;  %v635_v24 = vsel %vm268_vm3, %v631_v38, 0.0  ;;  %v657_v20 = vsel %vm243_vm15, %v2071_v25, 0.0  ;;  %v670_v38 = vmul.f32 %v1902_v14, %v2086_v11  ;;  %v769_v23 = vpop.permute.xlu0 %768 }
 0x1a8   : > { %v641_v21 = vmul.f32 %v1893_v10, %v635_v24  ;;  %v642_v44 = vmul.f32 %v1893_v10, %v636_v6  ;;  %v663_v3 = vmul.f32 %v1888_v7, %v657_v20  ;;  %vm453_vm1 = vcmask 646144  }
 0x1a9   : > { %v587_v31 = vpop.permute.xlu1 %586 }
 0x1aa   : > { %v593_v45 = vsel %vm592_vm4, %v587_v31, %v2046_v42 }
 0x1ab   : > { %v597_v56 = vadd.f32 %v593_v45, %v574_v26  ;;  %519 = vperm.xlu1 %1345, %v1744_v2   ;;  %v785_v7 = vpop.permute.xlu0 %784 }
 0x1ad   : > { %v618_v58 = vadd.f32 %v616_v19, %v597_v56  ;;  %v591_v34 = vpop.permute.xlu1 %590 }
 0x1ae   : > { %v594_v59 = vsel %vm592_vm4, %v2046_v42, %v591_v34  ;;  %vm497_vm4 = vcmask 629760  }
 0x1af   : > { %v643_v39 = vadd.f32 %v641_v21, %v618_v58  ;;  %v598_v32 = vadd.f32 %v594_v59, %v575_v60  ;;  %939 = vrot.lane.b32.xlu1 %v932_v40, %s1555_s16  ;;  %v789_v58 = vpop.permute.xlu0 %788 }
 0x1b0   : > { %1346 = vset.pattern.permute.xlu1 %v1562_v61 }
 0x1b1   : > { %v619_v42 = vadd.f32 %v617_v48, %v598_v32  ;;  %v687_v13 = vpop.permute.xlu1 %686  ;;  %v664_v1 = vadd.f32 %v662_v18, %v643_v39 }
 0x1b2   : > { %v690_v26 = vsel %vm350_vm10, %v2050_v57, %v687_v13  ;;  %v691_v31 = vsel %vm350_vm10, %v687_v13, %v2056_v55  ;;  %vm710_vm10 = vcmask 883712   ;;  %v2434_v55 = vmov 40  }
 0x1b3   : > { %v644_v25 = vadd.f32 %v642_v44, %v619_v42  ;;  %v672_v24 = vadd.f32 %v670_v38, %v664_v1  ;;  %993 = vperm.xlu1 %1346, %v1744_v2   ;;  %v808_v18 = vpop.permute.xlu0 %807  ;;  %v2435_v42 = vld [vmem:[#allocation14_spill] sm:$0xff] }
 0x1b4   : > { %v434_v13 = vsel %vm432_vm8, %v2435_v42, %v1960_v43  ;;  %vm790_vm8 = vcmask 752640  }
 0x1b5   : > { %v665_v45 = vadd.f32 %v663_v3, %v644_v25  ;;  %v694_v14 = vadd.f32 %v690_v26, %v672_v24  ;;  %v748_v11 = vpop.permute.xlu1 %747 }
 0x1b6   : > { %v750_v10 = vmul.f32 %v748_v11, %v2106_v35  ;;  %v751_v5 = vmul.f32 %v748_v11, %v2111_v37 }
 0x1b7   : > { %v673_v19 = vadd.f32 %v1928_v22, %v665_v45  ;;  %v702_v57 = vadd.f32 %v2038_v28, %v694_v14  ;;  %973 = vrot.lane.b32.xlu1 %v1774_v29, %s1557_s23  ;;  %v2246_v38 = vpop.permute.xlu0 %857  ;;  %v2437_v14 = vld [vmem:[#allocation16_spill] sm:$0xff] }
 0x1b8   : > { %1347 = vset.pattern.permute.xlu1 %v2434_v55 }
 0x1b9   : > { %v695_v54 = vadd.f32 %v691_v31, %v673_v19  ;;  %v707_v56 = vpop.permute.xlu1 %706  ;;  %v2436_v31 = vld [vmem:[#allocation15_spill] sm:$0xff] }
 0x1ba   : > { %v711_v40 = vsel %vm710_vm10, %v2060_v63, %v707_v56  ;;  %v712_v51 = vsel %vm710_vm10, %v707_v56, %v2068_v17  ;;  %vm484_vm10 = vcmask 637952  }
 0x1bb   : > { %v703_v35 = vadd.f32 %v2040_v36, %v695_v54  ;;  %v715_v22 = vsel %vm268_vm3, %v711_v40, 0.0  ;;  %v716_v28 = vsel %vm269_vm7, %v712_v51, 0.0  ;;  %999 = vperm.xlu1 %1347, %v1744_v2   ;;  %v452_v25 = vpop.permute.xlu0 %451 }
 0x1bc   : > { %v721_v37 = vmul.f32 %v2054_v52, %v715_v22  ;;  %v722_v49 = vmul.f32 %v2054_v52, %v716_v28 }
 0x1bd   : > { %v726_v21 = vpop.permute.xlu1 %725 }
 0x1be   : > { %v723_v63 = vadd.f32 %v721_v37, %v702_v57  ;;  %v724_v34 = vadd.f32 %v722_v49, %v703_v35  ;;  %v732_v17 = vsel %vm731_vm11, %v726_v21, %v2079_v41 }
 0x1bf   : > { %v736_v36 = vsel %vm242_vm13, %v732_v17, 0.0 }
 0x1c0   : > { %v742_v60 = vmul.f32 %v2062_v8, %v736_v36 }
 0x1c1   : > { %v730_v6 = vpop.permute.xlu1 %729 }
 0x1c2   : > { %v744_v59 = vadd.f32 %v742_v60, %v723_v63  ;;  %v733_v48 = vsel %vm731_vm11, %v2079_v41, %v730_v6  ;;  %v2253_v41 = vsel %vm261_vm6, %v434_v13, 0.0  ;;  %vm870_vm11 = vcmask 621568  }
 0x1c3   : > { %v737_v2 = vsel %vm243_vm15, %v733_v48, 0.0  ;;  %v781_v3 = vmul.f32 %v2436_v31, %v2253_v41 }
 0x1c4   : > { %v743_v52 = vmul.f32 %v2062_v8, %v737_v2  ;;  %v752_v39 = vadd.f32 %v750_v10, %v744_v59 }
 0x1c5   : > { %v799_v32 = vpop.permute.xlu1 %798 }
 0x1c6   : > { %v745_v20 = vadd.f32 %v743_v52, %v724_v34 }
 0x1c8   : > { %v753_v61 = vadd.f32 %v751_v5, %v745_v20  ;;  %v2261_v5 = vpop.permute.xlu0 %899 }
 0x1ca   : > { %v820_v44 = vpop.permute.xlu1 %819 }
 0x1cc   : > { %v496_v28 = vpop.permute.xlu0 %495 }
 0x1ce   : > { %v767_v1 = vpop.permute.xlu1 %766 }
 0x1cf   : > { %v770_v26 = vsel %vm419_vm12, %v2199_v0, %v767_v1  ;;  %v771_v8 = vsel %vm419_vm12, %v767_v1, %v769_v23 }
 0x1d0   : > { %v774_v24 = vadd.f32 %v770_v26, %v752_v39  ;;  %v775_v45 = vadd.f32 %v771_v8, %v753_v61  ;;  %v845_v17 = vpop.permute.xlu0 %844 }
 0x1d2   : > { %v782_v11 = vadd.f32 %v2437_v14, %v774_v24  ;;  %v783_v10 = vadd.f32 %v781_v3, %v775_v45  ;;  %v828_v43 = vpop.permute.xlu1 %827 }
 0x1d4   : > { %v849_v2 = vpop.permute.xlu0 %848 }
 0x1d6   : > { %v787_v19 = vpop.permute.xlu1 %786 }
 0x1d7   : > { %v791_v57 = vsel %vm790_vm8, %v785_v7, %v787_v19  ;;  %v792_v55 = vsel %vm790_vm8, %v787_v19, %v789_v58  ;;  %vm891_vm8 = vcmask 523264  }
 0x1d8   : > { %v795_v0 = vsel %vm268_vm3, %v791_v57, 0.0  ;;  %v796_v23 = vsel %vm269_vm7, %v792_v55, 0.0 }
 0x1d9   : > { %v801_v54 = vmul.f32 %v799_v32, %v795_v0  ;;  %v802_v56 = vmul.f32 %v799_v32, %v796_v23 }
 0x1da   : > { %v806_v40 = vpop.permute.xlu1 %805 }
 0x1db   : > { %v803_v51 = vadd.f32 %v801_v54, %v782_v11  ;;  %v804_v35 = vadd.f32 %v802_v56, %v783_v10  ;;  %v812_v22 = vsel %vm811_vm14, %v806_v40, %v808_v18 }
 0x1dc   : > { %v816_v37 = vsel %vm242_vm13, %v812_v22, 0.0 }
 0x1dd   : > { %v822_v49 = vmul.f32 %v820_v44, %v816_v37 }
 0x1de   : > { %v810_v7 = vpop.permute.xlu1 %809 }
 0x1df   : > { %v824_v21 = vadd.f32 %v822_v49, %v803_v51  ;;  %v813_v58 = vsel %vm811_vm14, %v808_v18, %v810_v7  ;;  %vm912_vm14 = vcmask 515072  }
 0x1e0   : > { %v817_v63 = vsel %vm243_vm15, %v813_v58, 0.0 }
 0x1e1   : > { %v823_v34 = vmul.f32 %v820_v44, %v817_v63  ;;  %v865_v44 = vpop.permute.xlu0 %864 }
 0x1e2   : > { %v448_v36 = vpop.permute.xlu1 %447 }
 0x1e3   : > { %v825_v60 = vadd.f32 %v823_v34, %v804_v35 }
 0x1e5   : > { %v869_v26 = vpop.permute.xlu0 %868 }
 0x1e6   : > { %v450_v6 = vpop.permute.xlu1 %449 }
 0x1e7   : > { %v454_v59 = vsel %vm453_vm1, %v448_v36, %v450_v6  ;;  %v455_v48 = vsel %vm453_vm1, %v450_v6, %v452_v25  ;;  %vm956_vm1 = vcmask 498688  }
 0x1e8   : > { %v458_v52 = vsel %vm250_vm9, %v454_v59, 0.0  ;;  %v459_v39 = vsel %vm251_vm2, %v455_v48, 0.0 }
 0x1e9   : > { %v830_v32 = vmul.f32 %v828_v43, %v458_v52  ;;  %v831_v18 = vmul.f32 %v828_v43, %v459_v39  ;;  %v888_v31 = vpop.permute.xlu0 %887 }
 0x1ea   : > { %v879_v20 = vpop.permute.xlu1 %878 }
 0x1eb   : > { %v832_v61 = vadd.f32 %v830_v32, %v824_v21  ;;  %v833_v42 = vadd.f32 %v831_v18, %v825_v60  ;;  %v444_v18 = vmul.f32 %v1869_v62, %v2253_v41 }
 0x1ed   : > { %v506_v10 = vpop.permute.xlu0 %505 }
 0x1ee   : > { %v492_v13 = vpop.permute.xlu1 %491 }
 0x1f1   : > { %v909_v7 = vpop.permute.xlu0 %908 }
 0x1f2   : > { %v494_v1 = vpop.permute.xlu1 %493 }
 0x1f3   : > { %v498_v25 = vsel %vm497_vm4, %v492_v13, %v494_v1  ;;  %v499_v24 = vsel %vm497_vm4, %v494_v1, %v496_v28 }
 0x1f4   : > { %v502_v43 = vsel %vm260_vm5, %v498_v25, 0.0  ;;  %v503_v19 = vsel %vm261_vm6, %v499_v24, 0.0 }
 0x1f5   : > { %v860_v23 = vmul.f32 %v2246_v38, %v502_v43  ;;  %v861_v54 = vmul.f32 %v2246_v38, %v503_v19  ;;  %v509_v62 = vmul.f32 %v506_v10, %v503_v19 }
 0x1f6   : > { %v462_v8 = vpop.permute.xlu1 %461 }
 0x1fa   : > { %v847_v3 = vpop.permute.xlu1 %846 }
 0x1fb   : > { %v850_v45 = vsel %vm484_vm10, %v845_v17, %v847_v3  ;;  %v851_v14 = vsel %vm484_vm10, %v847_v3, %v849_v2  ;;  %v2289_v17 = vpop.permute.xlu0 %985 }
 0x1fc   : > { %v854_v57 = vadd.f32 %v850_v45, %v832_v61  ;;  %v855_v55 = vadd.f32 %v851_v14, %v833_v42  ;;  %v465_v61 = vmul.f32 %v462_v8, %v459_v39 }
 0x1fe   : > { %v2277_v11 = vpop.permute.xlu1 %920  ;;  %v862_v22 = vadd.f32 %v860_v23, %v854_v57  ;;  %v863_v28 = vadd.f32 %v861_v54, %v855_v55  ;;  %v508_v57 = vmul.f32 %v506_v10, %v502_v43 }
 0x1ff   : > { %v953_v36 = vpop.permute.xlu0 %952 }
 0x202   : > { %v867_v0 = vpop.permute.xlu1 %866 }
 0x203   : > { %v871_v56 = vsel %vm870_vm11, %v865_v44, %v867_v0  ;;  %v872_v40 = vsel %vm870_vm11, %v867_v0, %v869_v26  ;;  %v479_v59 = vpop.permute.xlu0 %478  ;;  %v446_v44 = vadd.f32 %v444_v18, %v2169_v53 }
 0x204   : > { %v875_v51 = vsel %vm268_vm3, %v871_v56, 0.0  ;;  %v876_v35 = vsel %vm269_vm7, %v872_v40, 0.0 }
 0x205   : > { %v881_v37 = vmul.f32 %v879_v20, %v875_v51  ;;  %v882_v49 = vmul.f32 %v879_v20, %v876_v35  ;;  %v464_v20 = vmul.f32 %v462_v8, %v458_v52  ;;  %v467_v26 = vadd.f32 %v465_v61, %v446_v44 }
 0x206   : > { %v886_v21 = vpop.permute.xlu1 %885 }
 0x207   : > { %v883_v58 = vadd.f32 %v881_v37, %v862_v22  ;;  %v884_v63 = vadd.f32 %v882_v49, %v863_v28  ;;  %v483_v2 = vpop.permute.xlu0 %482  ;;  %v466_v1 = vadd.f32 %v464_v20, %v2156_v50  ;;  %v892_v25 = vsel %vm891_vm8, %v886_v21, %v888_v31 }
 0x208   : > { %v896_v55 = vsel %vm242_vm13, %v892_v25, 0.0  ;;  %vm943_vm13 = vcmask 506880  }
 0x209   : > { %v902_v56 = vmul.f32 %v2261_v5, %v896_v55 }
 0x20a   : > { %v890_v34 = vpop.permute.xlu1 %889 }
 0x20b   : > { %v938_v13 = vpop.permute.xlu0 %937  ;;  %v893_v24 = vsel %vm891_vm8, %v888_v31, %v890_v34  ;;  %v904_v15 = vadd.f32 %v902_v56, %v883_v58 }
 0x20c   : > { %v897_v50 = vsel %vm243_vm15, %v893_v24, 0.0 }
 0x20d   : > { %v903_v40 = vmul.f32 %v2261_v5, %v897_v50 }
 0x20e   : > { %v2291_v38 = vpop.permute.xlu1 %964 }
 0x20f   : > { %v942_v53 = vpop.permute.xlu0 %941  ;;  %v905_v49 = vadd.f32 %v903_v40, %v884_v63 }
 0x212   : > { %v907_v60 = vpop.permute.xlu1 %906 }
 0x213   : > { %v913_v39 = vsel %vm912_vm14, %v907_v60, %v909_v7  ;;  %v972_v12 = vpop.permute.xlu0 %971 }
 0x214   : > { %v917_v54 = vsel %vm250_vm9, %v913_v39, 0.0 }
 0x215   : > { %v923_v35 = vmul.f32 %v2277_v11, %v917_v54 }
 0x216   : > { %v911_v6 = vpop.permute.xlu1 %910 }
 0x217   : > { %v914_v8 = vsel %vm912_vm14, %v909_v7, %v911_v6 }
 0x218   : > { %v918_v10 = vsel %vm251_vm2, %v914_v8, 0.0  ;;  %vm977_vm2 = vcmask 490496   ;;  %v278_v8 = vmul.f32 %v2438_v33, %v1770_v27 }
 0x219   : > { %v924_v22 = vmul.f32 %v2277_v11, %v918_v10 }
 0x21a   : > { %v514_v48 = vpop.permute.xlu1 %513 }
 0x21e   : > { %v951_v32 = vpop.permute.xlu1 %950 }
 0x21f   : > { %v957_v7 = vsel %vm956_vm1, %v951_v32, %v953_v36 }
 0x220   : > { %v961_v18 = vsel %vm260_vm5, %v957_v7, 0.0 }
 0x221   : > { %v967_v20 = vmul.f32 %v2291_v38, %v961_v18 }
 0x222   : > { %v955_v42 = vpop.permute.xlu1 %954 }
 0x223   : > { %v958_v21 = vsel %vm956_vm1, %v953_v36, %v955_v42  ;;  %v976_v36 = vpop.permute.xlu0 %975 }
 0x224   : > { %v962_v11 = vsel %vm261_vm6, %v958_v21, 0.0 }
 0x225   : > { %v968_v61 = vmul.f32 %v2291_v38, %v962_v11 }
 0x226   : > { %v481_v3 = vpop.permute.xlu1 %480 }
 0x227   : > { %v485_v45 = vsel %vm484_vm10, %v479_v59, %v481_v3  ;;  %v486_v14 = vsel %vm484_vm10, %v481_v3, %v483_v2  ;;  %v926_v2 = vadd.f32 %v924_v22, %v905_v49 }
 0x228   : > { %v489_v41 = vadd.f32 %v485_v45, %v466_v1  ;;  %v490_v52 = vadd.f32 %v486_v14, %v467_v26 }
 0x22a   : > { %v510_v0 = vadd.f32 %v508_v57, %v489_v41  ;;  %v511_v23 = vadd.f32 %v509_v62, %v490_v52  ;;  %v520_v31 = vpop.permute.xlu1 %519 }
 0x22c   : > { %v516_v43 = vmul.f32 %v514_v48, %v510_v0  ;;  %v517_v19 = vmul.f32 %v514_v48, %v511_v23  ;;  %v925_v48 = vadd.f32 %v923_v35, %v904_v15  ;;  %v280_v0 = vmul.f32 %v2438_v33, %v1777_v30 }
 0x22e   : > { %v522_v16 = vadd.f32 %v520_v31, %v516_v43  ;;  %v523_v51 = vadd.f32 %v520_v31, %v517_v19  ;;  %v940_v46 = vpop.permute.xlu1 %939  ;;  %v2440_v31 = vld [vmem:[#allocation13_spill] sm:$0xff] }
 0x22f   : > { %v944_v6 = vsel %vm943_vm13, %v938_v13, %v940_v46  ;;  %v945_v5 = vsel %vm943_vm13, %v940_v46, %v942_v53  ;;  %v2439_v53 = vld [vmem:[#allocation12_spill] sm:$0xff] }
 0x230   : > { %v524_v28 = vmax.f32 %v522_v16, 0.0  ;;  %v525_v37 = vmax.f32 %v523_v51, 0.0  ;;  %v948_v58 = vadd.f32 %v944_v6, %v925_v48  ;;  %v949_v63 = vadd.f32 %v945_v5, %v926_v2 }
 0x231   : > { %v288_v55 = vmul.f32 %v2439_v53, %v278_v8  ;;  %v290_v23 = vmul.f32 %v2439_v53, %v280_v0 }
 0x232   : > { %v526_v34 = vmin.f32 %v524_v28, 6.0  ;;  %v527_v60 = vmin.f32 %v525_v37, 6.0  ;;  %v994_v59 = vpop.permute.xlu1 %993  ;;  %v969_v13 = vadd.f32 %v967_v20, %v948_v58  ;;  %v970_v1 = vadd.f32 %v968_v61, %v949_v63 }
 0x233   : > { %v295_v54 = vadd.f32 %v2440_v31, %v288_v55  ;;  %v297_v43 = vadd.f32 %v2440_v31, %v290_v23 }
 0x234   : > { %530 = vrot.lane.b32.xlu0 %v526_v34, %s1499_s21  ;;  %532 = vrot.lane.b32.xlu1 %v527_v60, %s1499_s21 }
 0x235   : > { %v298_v19 = vmax.f32 %v295_v54, 0.0 }
 0x236   : > { %v974_v32 = vpop.permute.xlu1 %973 }
 0x237   : > { %v978_v42 = vsel %vm977_vm2, %v972_v12, %v974_v32  ;;  %v979_v44 = vsel %vm977_vm2, %v974_v32, %v976_v36  ;;  %v301_v16 = vmin.f32 %v298_v19, 6.0 }
 0x238   : > { %v982_v4 = vsel %vm268_vm3, %v978_v42, 0.0  ;;  %v983_v9 = vsel %vm269_vm7, %v979_v44, 0.0 }
 0x239   : > { %v988_v26 = vmul.f32 %v2289_v17, %v982_v4  ;;  %v989_v3 = vmul.f32 %v2289_v17, %v983_v9  ;;  %v279_v17 = vmul.f32 %v2438_v33, %v1774_v29  ;;  %v300_v29 = vmax.f32 %v297_v43, 0.0 }
 0x23a   : > { %v1000_v45 = vpop.permute.xlu1 %999 }
 0x23b   : > { %v990_v25 = vadd.f32 %v988_v26, %v969_v13  ;;  %v991_v24 = vadd.f32 %v989_v3, %v970_v1  ;;  %v289_v50 = vmul.f32 %v2439_v53, %v279_v17  ;;  %v303_v28 = vmin.f32 %v300_v29, 6.0 }
 0x23d   : > { %v996_v14 = vmul.f32 %v994_v59, %v990_v25  ;;  %v997_v57 = vmul.f32 %v994_v59, %v991_v24  ;;  %v296_v10 = vadd.f32 %v2440_v31, %v289_v50 }
 0x23f   : > { %v1002_v38 = vadd.f32 %v1000_v45, %v996_v14  ;;  %v1003_v62 = vadd.f32 %v1000_v45, %v997_v57  ;;  %v299_v56 = vmax.f32 %v296_v10, 0.0 }
 0x241   : > { %v1004_v41 = vmax.f32 %v1002_v38, 0.0  ;;  %v1005_v52 = vmax.f32 %v1003_v62, 0.0  ;;  %v302_v46 = vmin.f32 %v299_v56, 6.0 }
 0x243   : > { %v1006_v47 = vmin.f32 %v1004_v41, 6.0  ;;  %v1007_v39 = vmin.f32 %v1005_v52, 6.0 }
 0x245   : > { %1010 = vrot.lane.b32.xlu0 %v1006_v47, %s1499_s21  ;;  %1012 = vrot.lane.b32.xlu1 %v1007_v39, %s1499_s21  ;;  %s197_s21 = scalar_lea.vmem [#allocation7], %s1158_s6  ;;  %s1037_s6 = scalar_lea.sflag [#allocation4], %s1730_s18 }
 0x246   : > { %s1053_s24 = sshll.u32 %s197_s21, 4  ;;  %s2353_s24 = int_to_ptr.vmem [resolvable:$true] %s1053_s24 }
 0x247   : > { %p1414_p9 = scmp.lt.s32.totalorder %s2353_s24, %s1412_s17 }
 0x2a6   : > { %v533_v27 = vpop.permute.xlu1 %532  ;;  %v531_v40 = vpop.permute.xlu0 %530 }
 0x2a7   : > { %v534_v51 = vsel %vm206_vm0, %v531_v40, %v533_v27  ;;  %v538_v35 = vadd.f32 %v531_v40, %v301_v16  ;;  %v540_v7 = vadd.f32 %v533_v27, %v303_v28 }
 0x2a8   : > { %v539_v30 = vadd.f32 %v534_v51, %v302_v46 }
 0x2b7   : > { %v1013_v22 = vpop.permute.xlu1 %1012  ;;  %v1011_v12 = vpop.permute.xlu0 %1010 }
 0x2b8   : > { %v1014_v37 = vsel %vm206_vm0, %v1011_v12, %v1013_v22  ;;  %v1018_v15 = vadd.f32 %v1011_v12, %v538_v35  ;;  %v1020_v21 = vadd.f32 %v1013_v22, %v540_v7 }
 0x2b9   : > { %v1019_v49 = vadd.f32 %v1014_v37, %v539_v30 }
 0x2ba   : > { %1024 = vrot.lane.b32.xlu0 %v1018_v15, %s1536_s30 }
 0x2bb   : > { %1026 = vrot.lane.b32.xlu1 %v1019_v49, %s1536_s30 }
 0x2be   : > { %1028 = vrot.lane.b32.xlu0 %v1020_v21, %s1536_s30  ;;  %s1407_s30 = scalar_lea.vmem %s2353_s24, 256 }
 0x2bf   : > { %p1408_p2 = scmp.ne.s32.totalorder %s2353_s24, %s1407_s30  ;;  %p1415_p12 = scmp.lt.s32.totalorder %s1413_s19, %s1407_s30 }
 0x2c1   : > { %p1409_p6 = pnand %p1408_p2, %p1680_p13  ;;  %p1416_p0 = por %p1415_p12, %p1414_p9 }
 0x2c3   : > { %p1410_p8 = pneg %p1409_p6 }
 0x2c5   : > { %p1417_p5 = pnand %p1416_p0, %p1410_p8 }
 0x32c   : > { %v1025_v34 = vpop.permute.xlu0 %1024 }
 0x32d   : > { %v1027_v60 = vpop.permute.xlu1 %1026 }
 0x32e   : > { %v1030_v6 = vsel %vm419_vm12, %v1025_v34, %v1027_v60 }
 0x32f   : > { %1034 = vst [vmem:[%s197_s21] sm:$0xff] %v1030_v6 }
 0x330   : > { %v1029_v5 = vpop.permute.xlu0 %1028 }
 0x331   : > { %v1031_v59 = vsel %vm419_vm12, %v1027_v60, %v1029_v5 }
 0x332   : > { %1035 = vst [vmem:[%s197_s21 + $0x8] sm:$0xff] %v1031_v59 }
 0x333   : > { %1420 = shalt.err (!%p1417_p5)
}
 0x334   : > { %s1421_s18 = scalar_lea.hbm %s2351_s8, 256  ;;  %s1425_s5 = scalar_lea.hbm %s2403_s2, 512 }
 0x335   : > { %p1422_p10 = scmp.ne.s32.totalorder %s2351_s8, %s1421_s18  ;;  %p1426_p7 = scmp.lt.u32.totalorder %s2351_s8, %s2403_s2 }
 0x336   : > { %p1427_p3 = scmp.lt.u32.totalorder %s1425_s5, %s1421_s18  ;;  %p1429_p2 = scmp.lt.u32.totalorder %s1421_s18, %s2351_s8 }
 0x337   : > { %p1423_p4 = pnand %p1422_p10, %p1680_p13 }
 0x338   : > { %p1428_p11 = por %p1427_p3, %p1426_p7 }
 0x339   : > { %p1424_p1 = pneg %p1423_p4 }
 0x33a   : > { %p1430_p6 = por %p1429_p2, %p1428_p11 }
 0x33c   : > { %p1431_p8 = pnand %p1430_p6, %p1424_p1 }
 0x33e   : > { %1434 = shalt.err (!%p1431_p8)
}
 0x33f   : > { %1174 = dma.vmem_to_hbm [thread:$0]  (%p1680_p13), %s2353_s24, 256, %s2351_s8, %s1037_s6  }
 0x340 PF: > { %s1065_s16 = sand.u32 1, %s1473_s9   ;;  %p2441_p9 = scmp.ne.s32.totalorder %s2417_s20, 0 }
 0x341   : > { %p2442_p12 = scmp.ge.s32.totalorder %s1493_s14, 2  ;;  %s1066_s23 = scalar_lea.sflag [#allocation4], %s1065_s16 }
 0x343   : > { %p1185_p0 = pnand %p2442_p12, %p2441_p9 }
 0x345   : > { %1468 = dma.done.wait (!%p1185_p0), %s1066_s23, 256  }
 0x346   : > { %1470 = vsyncadd (!%p1185_p0), %s1066_s23, 4294967040  ;;  %s19_s14 = sadd.s32 1, %s1493_s14   ;;  %s2443_s9 = smov %s1477_s10 }
 0x347   : > { %p16_p5 = scmp.ge.s32.totalorder %s19_s14, 4   ;;  %s2444_s10 = smov %s1481_s11 }
 0x348   : > { %s2445_s11 = smov %s1688_s28  ;;  %s2446_s12 = smov %s1489_s13 }
 0x349   : > { %s2447_s13 = smov %s2449_s25  ;;  %18 = sbr.rel (!%p16_p5) target bundleno = 7 (0x7), region = 78 }
 0x350   :  { %1071 = vsyncpa [#allocation3], 1 }
 0x351   :  { %1073 = vsyncpa [#allocation3 + $0x1], 1 }
 0x352   :  { %1074 = vsyncpa [#allocation6], 1 }
 0x353   :  { %1075 = vsyncpa [#allocation4], 1 }
 0x354   :  { %1077 = vsyncpa [#allocation4 + $0x1], 1 }

</bundles_post_ra>
